<compile_context>
chip_gen: v6e
topology: v6e:2x2x1
jax: 0.10.0
libtpu: 0.0.40
codegen_flags: <defaults>
</compile_context>

<pallas_src>
import jax
import jax.numpy as jnp
import numpy as np
from jax import lax
from jax.experimental import pallas as pl
from jax.experimental.pallas import tpu as pltpu

# ---------------- model dimensions ----------------
BATCH = 2
CIN = 3          # input image channels
COUT = 3         # first_conv output channels
H = W = 16       # small spatial size
NFEAT = 1024     # densenet121 feature dim
NACTIONS = 2
HIST_COUNT = 4
HIST_DIM = NACTIONS * HIST_COUNT   # 8
HIDDEN = 512
BN_EPS = 1e-5
OUT_LANES = 128  # lane-padded merged output: policy @ [:, :2], value @ [:, 2:3]


def _elu(v):
    return jnp.where(v > 0.0, v, jnp.exp(jnp.minimum(v, 0.0)) - 1.0)


# ================= single fused Pallas kernel =================
def fused_kernel(x_ref, a_ref, bpool_ref, wpf_ref, hist_ref,
                 w1h_ref, b1_ref, w2_ref, b2_ref,
                 wv1_ref, bv1_ref, wv2_hbm, bv2_ref, wv3_ref, bv3_ref,
                 out_ref, wv2_buf, dma_sem):
    f32 = jnp.float32
    bf16 = jnp.bfloat16

    # Kick off the only large weight transfer (wv2, 512x512 bf16) immediately so it
    # overlaps the front-end + DPG-head compute; wait right before its dot.
    wv2_copy = pltpu.make_async_copy(wv2_hbm, wv2_buf, dma_sem)
    wv2_copy.start()

    # ---- folded BatchNorm2d(eval) + Conv2d(3x3, pad=1) + global-average-pool ----
    # The whole path is linear in x, precomputed on the host as A (768, 3) + bias.
    pooled = jnp.dot(x_ref[...], a_ref[...], preferred_element_type=f32) + bpool_ref[...]

    # ---- folded densenet stand-in projection + feature halves of both heads ----
    # W_pf = proj_w @ [dpg_w1_feat | dv_w1_feat]  (3, 2*HIDDEN); proj_b folded into b1/bv1.
    both = jnp.dot(pooled, wpf_ref[...], preferred_element_type=f32)      # (B, 2*HIDDEN)

    # ---- DPG head: Linear(cat([feat, hist])) -> Tanh -> Linear(512->2) ----
    # concat expressed as split matmul: cat([a, b]) @ W == a @ W_a + b @ W_b
    h = jnp.tanh(both[:, :HIDDEN]
                 + jnp.dot(hist_ref[...], w1h_ref[...], preferred_element_type=f32)
                 + b1_ref[...])
    policy = jnp.dot(h, w2_ref[...], preferred_element_type=f32) + b2_ref[...]

    # ---- DV head: ELU(Linear(cat([feat, policy]))) -> ELU(Linear) -> Linear ----
    v = _elu(both[:, HIDDEN:]
             + jnp.dot(policy, wv1_ref[...], preferred_element_type=f32)
             + bv1_ref[...])
    wv2_copy.wait()
    v = _elu(jnp.dot(v.astype(bf16), wv2_buf[...], preferred_element_type=f32)
             + bv2_ref[...])
    value = jnp.dot(v, wv3_ref[...], preferred_element_type=f32) + bv3_ref[...]

    # ---- single lane-padded output ----
    out_ref[...] = jnp.zeros((BATCH, OUT_LANES), f32)
    out_ref[:, 0:NACTIONS] = policy
    out_ref[:, NACTIONS:NACTIONS + 1] = value


def combined_forward_pallas(x, hist, kp):
    vmem = pl.BlockSpec(memory_space=pltpu.MemorySpace.VMEM)
    anyspec = pl.BlockSpec(memory_space=pl.ANY)   # wv2 stays in HBM; DMA'd manually
    x_flat = x.reshape(BATCH, CIN * H * W)        # lane-dense presentation of the image
    out = pl.pallas_call(
        fused_kernel,
        out_shape=jax.ShapeDtypeStruct((BATCH, OUT_LANES), jnp.float32),
        in_specs=[vmem] * 11 + [anyspec] + [vmem] * 3,
        out_specs=vmem,
        scratch_shapes=[pltpu.VMEM((HIDDEN, HIDDEN), jnp.bfloat16),
                        pltpu.SemaphoreType.DMA],
        compiler_params=pltpu.CompilerParams(vmem_limit_bytes=16 << 20),
    )(x_flat, kp["A"], kp["b_pool"], kp["W_pf"], hist,
      kp["w1_hist"], kp["b1"], kp["w2"], kp["b2"],
      kp["wv1_act"], kp["bv1"], kp["wv2"], kp["bv2"], kp["wv3"], kp["bv3"])
    policy = out[:, :NACTIONS].reshape(-1, NACTIONS)
    value = out[:, NACTIONS:NACTIONS + 1]
    return policy, value


@jax.jit
def combined_forward(x_nchw, history_vec, kp):
    return combined_forward_pallas(x_nchw.astype(jnp.float32),
                                   history_vec.astype(jnp.float32), kp)


# ================= parameter init (deterministic, PyTorch-style fan-in uniform) =================
def init_params(key):
    def uniform(k, shape, bound):
        return jax.random.uniform(k, shape, jnp.float32, -bound, bound)

    keys = jax.random.split(key, 20)
    p = {}
    # BatchNorm2d(3), eval mode running stats
    p["bn_gamma"] = 1.0 + 0.1 * jax.random.normal(keys[0], (CIN,), jnp.float32)
    p["bn_beta"] = 0.1 * jax.random.normal(keys[1], (CIN,), jnp.float32)
    p["bn_mean"] = 0.1 * jax.random.normal(keys[2], (CIN,), jnp.float32)
    p["bn_var"] = 1.0 + 0.1 * jnp.abs(jax.random.normal(keys[3], (CIN,), jnp.float32))
    # Conv2d(3, 3, kernel_size=3, padding=1), stored HWIO
    cb = 1.0 / np.sqrt(CIN * 9)
    p["conv_w_hwio"] = uniform(keys[4], (3, 3, CIN, COUT), cb)
    p["conv_b"] = uniform(keys[5], (COUT,), cb)
    # densenet121 stand-in projection  (TODO(synk): replaces the pretrained backbone)
    p["proj_w"] = uniform(keys[6], (COUT, NFEAT), 1.0 / np.sqrt(COUT))
    p["proj_b"] = uniform(keys[7], (NFEAT,), 1.0 / np.sqrt(COUT))
    # DPGNetwork
    b1 = 1.0 / np.sqrt(NFEAT + HIST_DIM)
    p["dpg_w1"] = uniform(keys[8], (NFEAT + HIST_DIM, HIDDEN), b1)
    p["dpg_b1"] = uniform(keys[9], (HIDDEN,), b1)
    b2 = 1.0 / np.sqrt(HIDDEN)
    p["dpg_w2"] = uniform(keys[10], (HIDDEN, NACTIONS), b2)
    p["dpg_b2"] = uniform(keys[11], (NACTIONS,), b2)
    # DVNetwork
    bv1 = 1.0 / np.sqrt(NFEAT + NACTIONS)
    p["dv_w1"] = uniform(keys[12], (NFEAT + NACTIONS, HIDDEN), bv1)
    p["dv_b1"] = uniform(keys[13], (HIDDEN,), bv1)
    p["dv_w2"] = uniform(keys[14], (HIDDEN, HIDDEN), b2)
    p["dv_b2"] = uniform(keys[15], (HIDDEN,), b2)
    p["dv_w3"] = uniform(keys[16], (HIDDEN, 1), 0.003)   # init_w = 0.003
    p["dv_b3"] = uniform(keys[17], (1,), 0.003)
    return p


def prep_params(p):
    """One-time host-side prep.

    * Folds BN(eval) + Conv3x3(pad=1) + global-avg-pool into a single (CIN*H*W, COUT)
      matrix A and bias (the zero-padding boundary is handled by per-(kh,kw) valid-row/col
      masks).
    * Collapses the linear chain through the 3-dim pooled bottleneck:
      W_pf = proj_w @ [dpg_w1_feat | dv_w1_feat], proj_b folded into b1/bv1.
    * Stores wv2 in bf16 (the only large weight); everything else tiny, kept f32.
    """
    f32 = jnp.float32
    bf16 = jnp.bfloat16
    scale = p["bn_gamma"] / jnp.sqrt(p["bn_var"] + BN_EPS)
    shift = p["bn_beta"] - p["bn_mean"] * scale

    # valid row/col masks: kh/kw = 0 drops last row/col, 1 keeps all, 2 drops first.
    rmask = jnp.stack([
        jnp.concatenate([jnp.ones(H - 1), jnp.zeros(1)]),
        jnp.ones(H),
        jnp.concatenate([jnp.zeros(1), jnp.ones(H - 1)]),
    ]).astype(f32)                                                      # (3, H)
    cmask = jnp.stack([
        jnp.concatenate([jnp.ones(W - 1), jnp.zeros(1)]),
        jnp.ones(W),
        jnp.concatenate([jnp.zeros(1), jnp.ones(W - 1)]),
    ]).astype(f32)                                                      # (3, W)
    # M[ci,h,w,co] = sum_{kh,kw} conv_w[kh,kw,ci,co] * rmask[kh,h] * cmask[kw,w]
    M = jnp.einsum('xyio,xh,yw->ihwo', p["conv_w_hwio"], rmask, cmask)  # (CIN,H,W,COUT)
    inv_hw = 1.0 / (H * W)
    A = (scale[:, None, None, None] * M * inv_hw).reshape(CIN * H * W, COUT)
    b_pool = p["conv_b"] + (shift[:, None, None, None] * M * inv_hw).sum(axis=(0, 1, 2))

    # rank-3 bottleneck fold of the densenet stand-in projection into both heads.
    w1_both = jnp.concatenate([p["dpg_w1"][:NFEAT], p["dv_w1"][:NFEAT]], axis=1)  # (1024, 1024)
    W_pf = p["proj_w"] @ w1_both                     # (COUT, 2*HIDDEN)
    b_pf = p["proj_b"] @ w1_both                     # (2*HIDDEN,)
    b1 = p["dpg_b1"] + b_pf[:HIDDEN]
    bv1 = p["dv_b1"] + b_pf[HIDDEN:]

    return dict(
        A=A.astype(f32),                              # (768, COUT)
        b_pool=b_pool.reshape(1, COUT).astype(f32),
        W_pf=W_pf.astype(f32),                        # (COUT, 1024)
        w1_hist=p["dpg_w1"][NFEAT:].astype(f32),      # (HIST_DIM, HIDDEN)
        b1=b1.reshape(1, HIDDEN).astype(f32),
        w2=p["dpg_w2"].astype(f32),                   # (HIDDEN, NACTIONS)
        b2=p["dpg_b2"].reshape(1, NACTIONS).astype(f32),
        wv1_act=p["dv_w1"][NFEAT:].astype(f32),       # (NACTIONS, HIDDEN)
        bv1=bv1.reshape(1, HIDDEN).astype(f32),
        wv2=p["dv_w2"].astype(bf16),                  # (HIDDEN, HIDDEN) — the only big weight
        bv2=p["dv_b2"].reshape(1, HIDDEN).astype(f32),
        wv3=p["dv_w3"].astype(f32),                   # (HIDDEN, 1)
        bv3=p["dv_b3"].reshape(1, 1).astype(f32),
    )


# ================= pure-JAX reference: ORIGINAL (unfolded) path =================
def reference_forward(x, hist, p):
    """BN + conv(lax.conv) + GAP + proj + heads with concatenation, mirroring only the
    kernel's bf16 quantization point (operands of the wv2 dot)."""
    f32 = jnp.float32

    def qbf(a):  # mirror the kernel's bf16 operand rounding, compute in f32
        return a.astype(jnp.bfloat16).astype(f32)

    x = x.astype(f32)
    hist = hist.astype(f32)
    scale = p["bn_gamma"] / jnp.sqrt(p["bn_var"] + BN_EPS)
    shift = p["bn_beta"] - p["bn_mean"] * scale
    x_bn = x * scale[None, :, None, None] + shift[None, :, None, None]
    w_oihw = jnp.transpose(p["conv_w_hwio"], (3, 2, 0, 1))       # (co, ci, kh, kw)
    conv = lax.conv_general_dilated(
        x_bn, w_oihw, (1, 1), "SAME",
        dimension_numbers=("NCHW", "OIHW", "NCHW")) + p["conv_b"].reshape(1, COUT, 1, 1)
    pooled = conv.mean(axis=(2, 3))                              # adaptive_avg_pool2d(1,1)
    feat = pooled @ p["proj_w"] + p["proj_b"]                    # densenet stand-in

    h = jnp.tanh(jnp.concatenate([feat, hist], axis=1) @ p["dpg_w1"] + p["dpg_b1"])
    policy = h @ p["dpg_w2"] + p["dpg_b2"]

    v = _elu(jnp.concatenate([feat, policy], axis=1) @ p["dv_w1"] + p["dv_b1"])
    v = _elu(qbf(v) @ qbf(p["dv_w2"]) + p["dv_b2"])
    value = v @ p["dv_w3"] + p["dv_b3"]
    return policy.reshape(-1, 2), value


if __name__ == "__main__":
    key = jax.random.PRNGKey(0)
    kx, khist, kpar = jax.random.split(key, 3)
    x = jax.random.normal(kx, (BATCH, CIN, H, W), jnp.float32)          # NCHW, like PyTorch
    history_vec = jax.random.normal(khist, (BATCH, HIST_DIM), jnp.float32)
    params = init_params(kpar)
    kparams = prep_params(params)

    policy, value = combined_forward(x, history_vec, kparams)
    jax.block_until_ready((policy, value))

    ref_policy, ref_value = reference_forward(x, history_vec, params)
    np.testing.assert_allclose(np.asarray(policy), np.asarray(ref_policy), rtol=2e-3, atol=2e-3)
    np.testing.assert_allclose(np.asarray(value), np.asarray(ref_value), rtol=2e-3, atol=2e-3)
    assert policy.shape == (BATCH, NACTIONS) and value.shape == (BATCH, 1)

    print("KERNEL_OK")
</pallas_src>

<mosaic_0001>
module attributes {stable_mosaic.version = 11 : i64} {
  func.func @fused_kernel(%arg0: memref<2x768xf32, #tpu.memory_space<vmem>>, %arg1: memref<768x3xf32, #tpu.memory_space<vmem>>, %arg2: memref<1x3xf32, #tpu.memory_space<vmem>>, %arg3: memref<3x1024xf32, #tpu.memory_space<vmem>>, %arg4: memref<2x8xf32, #tpu.memory_space<vmem>>, %arg5: memref<8x512xf32, #tpu.memory_space<vmem>>, %arg6: memref<1x512xf32, #tpu.memory_space<vmem>>, %arg7: memref<512x2xf32, #tpu.memory_space<vmem>>, %arg8: memref<1x2xf32, #tpu.memory_space<vmem>>, %arg9: memref<2x512xf32, #tpu.memory_space<vmem>>, %arg10: memref<1x512xf32, #tpu.memory_space<vmem>>, %arg11: memref<512x512xbf16, #tpu.memory_space<any>>, %arg12: memref<1x512xf32, #tpu.memory_space<vmem>>, %arg13: memref<512x1xf32, #tpu.memory_space<vmem>>, %arg14: memref<1x1xf32, #tpu.memory_space<vmem>>, %arg15: memref<2x128xf32, #tpu.memory_space<vmem>>, %arg16: memref<512x512xbf16, #tpu.memory_space<vmem>>, %arg17: memref<!tpu.dma_semaphore, #tpu.memory_space<semaphore_mem>>) attributes {dimension_semantics = [], scalar_prefetch = 0 : i64, scratch_operands = 2 : i64, tpu.core_type = #tpu.core_type<tc>} {
    tpu.enqueue_dma source(%arg11 : memref<512x512xbf16, #tpu.memory_space<any>>) target(%arg16 : memref<512x512xbf16, #tpu.memory_space<vmem>>) target_semaphore(%arg17 : memref<!tpu.dma_semaphore, #tpu.memory_space<semaphore_mem>>)
    %c0 = arith.constant 0 : index
    %c0_0 = arith.constant 0 : index
    %0 = vector.load %arg0[%c0, %c0_0] : memref<2x768xf32, #tpu.memory_space<vmem>>, vector<2x768xf32>
    %c0_1 = arith.constant 0 : index
    %c0_2 = arith.constant 0 : index
    %1 = vector.load %arg1[%c0_1, %c0_2] : memref<768x3xf32, #tpu.memory_space<vmem>>, vector<768x3xf32>
    %cst = arith.constant dense<0.000000e+00> : vector<2x3xf32>
    %2 = tpu.matmul %0, %1, %cst {dimension_numbers = #tpu.dot_dimension_numbers<[1], [0], [0], [1], [0, 0, 1, 1], [], []>} : vector<2x768xf32>, vector<768x3xf32>, vector<2x3xf32> -> vector<2x3xf32>
    %c0_3 = arith.constant 0 : index
    %c0_4 = arith.constant 0 : index
    %3 = vector.load %arg2[%c0_3, %c0_4] : memref<1x3xf32, #tpu.memory_space<vmem>>, vector<1x3xf32>
    %4 = vector.broadcast %3 : vector<1x3xf32> to vector<2x3xf32>
    %5 = arith.addf %2, %4 : vector<2x3xf32>
    %c0_5 = arith.constant 0 : index
    %c0_6 = arith.constant 0 : index
    %6 = vector.load %arg3[%c0_5, %c0_6] : memref<3x1024xf32, #tpu.memory_space<vmem>>, vector<3x1024xf32>
    %cst_7 = arith.constant dense<0.000000e+00> : vector<2x1024xf32>
    %7 = tpu.matmul %5, %6, %cst_7 {dimension_numbers = #tpu.dot_dimension_numbers<[1], [0], [0], [1], [0, 0, 1, 1], [], []>} : vector<2x3xf32>, vector<3x1024xf32>, vector<2x1024xf32> -> vector<2x1024xf32>
    %8 = vector.extract_strided_slice %7 {offsets = [0, 0], sizes = [2, 512], strides = [1, 1]} : vector<2x1024xf32> to vector<2x512xf32>
    %c0_8 = arith.constant 0 : index
    %c0_9 = arith.constant 0 : index
    %9 = vector.load %arg4[%c0_8, %c0_9] : memref<2x8xf32, #tpu.memory_space<vmem>>, vector<2x8xf32>
    %c0_10 = arith.constant 0 : index
    %c0_11 = arith.constant 0 : index
    %10 = vector.load %arg5[%c0_10, %c0_11] : memref<8x512xf32, #tpu.memory_space<vmem>>, vector<8x512xf32>
    %cst_12 = arith.constant dense<0.000000e+00> : vector<2x512xf32>
    %11 = tpu.matmul %9, %10, %cst_12 {dimension_numbers = #tpu.dot_dimension_numbers<[1], [0], [0], [1], [0, 0, 1, 1], [], []>} : vector<2x8xf32>, vector<8x512xf32>, vector<2x512xf32> -> vector<2x512xf32>
    %12 = arith.addf %8, %11 : vector<2x512xf32>
    %c0_13 = arith.constant 0 : index
    %c0_14 = arith.constant 0 : index
    %13 = vector.load %arg6[%c0_13, %c0_14] : memref<1x512xf32, #tpu.memory_space<vmem>>, vector<1x512xf32>
    %14 = vector.broadcast %13 : vector<1x512xf32> to vector<2x512xf32>
    %15 = arith.addf %12, %14 : vector<2x512xf32>
    %16 = math.tanh %15 : vector<2x512xf32>
    %c0_15 = arith.constant 0 : index
    %c0_16 = arith.constant 0 : index
    %17 = vector.load %arg7[%c0_15, %c0_16] : memref<512x2xf32, #tpu.memory_space<vmem>>, vector<512x2xf32>
    %cst_17 = arith.constant dense<0.000000e+00> : vector<2x2xf32>
    %18 = tpu.matmul %16, %17, %cst_17 {dimension_numbers = #tpu.dot_dimension_numbers<[1], [0], [0], [1], [0, 0, 1, 1], [], []>} : vector<2x512xf32>, vector<512x2xf32>, vector<2x2xf32> -> vector<2x2xf32>
    %c0_18 = arith.constant 0 : index
    %c0_19 = arith.constant 0 : index
    %19 = vector.load %arg8[%c0_18, %c0_19] : memref<1x2xf32, #tpu.memory_space<vmem>>, vector<1x2xf32>
    %20 = vector.broadcast %19 : vector<1x2xf32> to vector<2x2xf32>
    %21 = arith.addf %18, %20 : vector<2x2xf32>
    %22 = vector.extract_strided_slice %7 {offsets = [0, 512], sizes = [2, 512], strides = [1, 1]} : vector<2x1024xf32> to vector<2x512xf32>
    %c0_20 = arith.constant 0 : index
    %c0_21 = arith.constant 0 : index
    %23 = vector.load %arg9[%c0_20, %c0_21] : memref<2x512xf32, #tpu.memory_space<vmem>>, vector<2x512xf32>
    %cst_22 = arith.constant dense<0.000000e+00> : vector<2x512xf32>
    %24 = tpu.matmul %21, %23, %cst_22 {dimension_numbers = #tpu.dot_dimension_numbers<[1], [0], [0], [1], [0, 0, 1, 1], [], []>} : vector<2x2xf32>, vector<2x512xf32>, vector<2x512xf32> -> vector<2x512xf32>
    %25 = arith.addf %22, %24 : vector<2x512xf32>
    %c0_23 = arith.constant 0 : index
    %c0_24 = arith.constant 0 : index
    %26 = vector.load %arg10[%c0_23, %c0_24] : memref<1x512xf32, #tpu.memory_space<vmem>>, vector<1x512xf32>
    %27 = vector.broadcast %26 : vector<1x512xf32> to vector<2x512xf32>
    %28 = arith.addf %25, %27 : vector<2x512xf32>
    %cst_25 = arith.constant 0.000000e+00 : f32
    %29 = vector.broadcast %cst_25 : f32 to vector<2x512xf32>
    %30 = arith.cmpf ogt, %28, %29 : vector<2x512xf32>
    %cst_26 = arith.constant 0.000000e+00 : f32
    %31 = vector.broadcast %cst_26 : f32 to vector<2x512xf32>
    %32 = arith.minimumf %28, %31 : vector<2x512xf32>
    %33 = math.exp %32 : vector<2x512xf32>
    %cst_27 = arith.constant 1.000000e+00 : f32
    %34 = vector.broadcast %cst_27 : f32 to vector<2x512xf32>
    %35 = arith.subf %33, %34 : vector<2x512xf32>
    %36 = arith.select %30, %28, %35 : vector<2x512xi1>, vector<2x512xf32>
    tpu.wait_dma2 semaphore(%arg17 : memref<!tpu.dma_semaphore, #tpu.memory_space<semaphore_mem>>) src(%arg11 : memref<512x512xbf16, #tpu.memory_space<any>>) dst(%arg16 : memref<512x512xbf16, #tpu.memory_space<vmem>>)
    %37 = arith.truncf %36 : vector<2x512xf32> to vector<2x512xbf16>
    %c0_28 = arith.constant 0 : index
    %c0_29 = arith.constant 0 : index
    %38 = vector.load %arg16[%c0_28, %c0_29] : memref<512x512xbf16, #tpu.memory_space<vmem>>, vector<512x512xbf16>
    %cst_30 = arith.constant dense<0.000000e+00> : vector<2x512xf32>
    %39 = tpu.matmul %37, %38, %cst_30 {dimension_numbers = #tpu.dot_dimension_numbers<[1], [0], [0], [1], [0, 0, 1, 1], [], []>} : vector<2x512xbf16>, vector<512x512xbf16>, vector<2x512xf32> -> vector<2x512xf32>
    %c0_31 = arith.constant 0 : index
    %c0_32 = arith.constant 0 : index
    %40 = vector.load %arg12[%c0_31, %c0_32] : memref<1x512xf32, #tpu.memory_space<vmem>>, vector<1x512xf32>
    %41 = vector.broadcast %40 : vector<1x512xf32> to vector<2x512xf32>
    %42 = arith.addf %39, %41 : vector<2x512xf32>
    %cst_33 = arith.constant 0.000000e+00 : f32
    %43 = vector.broadcast %cst_33 : f32 to vector<2x512xf32>
    %44 = arith.cmpf ogt, %42, %43 : vector<2x512xf32>
    %cst_34 = arith.constant 0.000000e+00 : f32
    %45 = vector.broadcast %cst_34 : f32 to vector<2x512xf32>
    %46 = arith.minimumf %42, %45 : vector<2x512xf32>
    %47 = math.exp %46 : vector<2x512xf32>
    %cst_35 = arith.constant 1.000000e+00 : f32
    %48 = vector.broadcast %cst_35 : f32 to vector<2x512xf32>
    %49 = arith.subf %47, %48 : vector<2x512xf32>
    %50 = arith.select %44, %42, %49 : vector<2x512xi1>, vector<2x512xf32>
    %c0_36 = arith.constant 0 : index
    %c0_37 = arith.constant 0 : index
    %51 = vector.load %arg13[%c0_36, %c0_37] : memref<512x1xf32, #tpu.memory_space<vmem>>, vector<512x1xf32>
    %cst_38 = arith.constant dense<0.000000e+00> : vector<2x1xf32>
    %52 = tpu.matmul %50, %51, %cst_38 {dimension_numbers = #tpu.dot_dimension_numbers<[1], [0], [0], [1], [0, 0, 1, 1], [], []>} : vector<2x512xf32>, vector<512x1xf32>, vector<2x1xf32> -> vector<2x1xf32>
    %c0_39 = arith.constant 0 : index
    %c0_40 = arith.constant 0 : index
    %53 = vector.load %arg14[%c0_39, %c0_40] : memref<1x1xf32, #tpu.memory_space<vmem>>, vector<1x1xf32>
    %54 = vector.broadcast %53 : vector<1x1xf32> to vector<2x1xf32>
    %55 = arith.addf %52, %54 : vector<2x1xf32>
    %cst_41 = arith.constant 0.000000e+00 : f32
    %56 = vector.broadcast %cst_41 : f32 to vector<2x128xf32>
    %c0_42 = arith.constant 0 : index
    %c0_43 = arith.constant 0 : index
    %57 = vector.load %arg15[%c0_42, %c0_43] : memref<2x128xf32, #tpu.memory_space<vmem>>, vector<2x128xf32>
    tpu.vector_store %arg15[%c0_42, %c0_43], %56 {strides = array<i32>} : memref<2x128xf32, #tpu.memory_space<vmem>>, vector<2x128xf32>,
    %c0_44 = arith.constant 0 : index
    %c0_45 = arith.constant 0 : index
    %58 = vector.load %arg15[%c0_44, %c0_45] : memref<2x128xf32, #tpu.memory_space<vmem>>, vector<2x2xf32>
    tpu.vector_store %arg15[%c0_44, %c0_45], %21 {strides = array<i32>} : memref<2x128xf32, #tpu.memory_space<vmem>>, vector<2x2xf32>,
    %c0_46 = arith.constant 0 : index
    %c2 = arith.constant 2 : index
    %59 = vector.load %arg15[%c0_46, %c2] : memref<2x128xf32, #tpu.memory_space<vmem>>, vector<2x1xf32>
    tpu.vector_store %arg15[%c0_46, %c2], %55 {strides = array<i32>} : memref<2x128xf32, #tpu.memory_space<vmem>>, vector<2x1xf32>,
    return
  }
}

</mosaic_0001>

<bundles_post_ra>
// kernel: combined_forward.1
= control target key start
LH: loop header
LB: loop body
LE: loop exit
PB: predicated region body
PF: predicated region fallthrough
CT: control target
= control target key end

     0   :  { %s5119_s0 = inlined_call_operand.vmem [shape: f32[2,768], index: 0, kind: input, shape index: {}]   ;;  %s5120_s1 = inlined_call_operand.vmem [shape: f32[768,3], index: 1, kind: input, shape index: {}]   ;;  %s5121_s2 = inlined_call_operand.vmem [shape: f32[1,3], index: 2, kind: input, shape index: {}]   ;;  %s5122_s3 = inlined_call_operand.vmem [shape: f32[3,1024], index: 3, kind: input, shape index: {}]   ;;  %s5123_s4 = inlined_call_operand.vmem [shape: f32[2,8], index: 4, kind: input, shape index: {}]   ;;  %s5124_s5 = inlined_call_operand.vmem [shape: f32[8,512], index: 5, kind: input, shape index: {}]   ;;  %s5125_s6 = inlined_call_operand.vmem [shape: f32[1,512], index: 6, kind: input, shape index: {}]   ;;  %s5126_s7 = inlined_call_operand.vmem [shape: f32[512,2], index: 7, kind: input, shape index: {}]   ;;  %s5127_s8 = inlined_call_operand.vmem [shape: f32[1,2], index: 8, kind: input, shape index: {}]   ;;  %s5128_s9 = inlined_call_operand.vmem [shape: f32[2,512], index: 9, kind: input, shape index: {}]   ;;  %s5129_s10 = inlined_call_operand.vmem [shape: f32[1,512], index: 10, kind: input, shape index: {}]   ;;  %s5130_s11 = inlined_call_operand.vmem [shape: bf16[512,512], index: 11, kind: input, shape index: {}]   ;;  %s5131_s12 = inlined_call_operand.vmem [shape: f32[1,512], index: 12, kind: input, shape index: {}]   ;;  %s5132_s13 = inlined_call_operand.vmem [shape: f32[512,1], index: 13, kind: input, shape index: {}]   ;;  %s5133_s14 = inlined_call_operand.<no memory space> [shape: f32[1,1], index: 14, kind: input, shape index: {}]   ;;  %s5134_s15 = inlined_call_operand.vmem [shape: f32[2,128], index: 15, kind: output, shape index: {}]  }
   0x1   :  { %v20_v0 = vstv %s5133_s14  ;;  %v3390_v1 = vld [vmem:[%s5130_s11] sm:$0xff]  ;;  %v3395_v2 = vld [vmem:[%s5130_s11 + $0x8] sm:$0xff]  ;;  %v3400_v3 = vld [vmem:[%s5130_s11 + $0x10] sm:$0xff] }
   0x2   :  { %5232 = vst [vmem:[#allocation7_spill] sm:$0xff] %v3395_v2  ;;  %21 = vst [vmem:[#allocation4] sm:$0x1] %v20_v0  ;;  %v3405_v4 = vld [vmem:[%s5130_s11 + $0x18] sm:$0xff]  ;;  %v3410_v5 = vld [vmem:[%s5130_s11 + $0x20] sm:$0xff] }
   0x3   :  { %5233 = vst [vmem:[#allocation8_spill] sm:$0xff] %v3405_v4  ;;  %v3415_v6 = vld [vmem:[%s5130_s11 + $0x28] sm:$0xff]  ;;  %v3420_v7 = vld [vmem:[%s5130_s11 + $0x30] sm:$0xff]  ;;  %v3425_v8 = vld [vmem:[%s5130_s11 + $0x38] sm:$0xff] }
   0x4   :  { %5234 = vst [vmem:[#allocation9_spill] sm:$0xff] %v3415_v6  ;;  %5235 = vst [vmem:[#allocation10_spill] sm:$0xff] %v3425_v8  ;;  %v3430_v9 = vld [vmem:[%s5130_s11 + $0x40] sm:$0xff]  ;;  %v3435_v10 = vld [vmem:[%s5130_s11 + $0x48] sm:$0xff] }
   0x5   :  { %5236 = vst [vmem:[#allocation11_spill] sm:$0xff] %v3435_v10  ;;  %v3440_v11 = vld [vmem:[%s5130_s11 + $0x50] sm:$0xff]  ;;  %v3445_v12 = vld [vmem:[%s5130_s11 + $0x58] sm:$0xff]  ;;  %v3450_v13 = vld [vmem:[%s5130_s11 + $0x60] sm:$0xff] }
   0x6   :  { %5237 = vst [vmem:[#allocation12_spill] sm:$0xff] %v3445_v12  ;;  %v3455_v14 = vld [vmem:[%s5130_s11 + $0x68] sm:$0xff]  ;;  %v3460_v15 = vld [vmem:[%s5130_s11 + $0x70] sm:$0xff]  ;;  %v3465_v16 = vld [vmem:[%s5130_s11 + $0x78] sm:$0xff] }
   0x7   :  { %5238 = vst [vmem:[#allocation13_spill] sm:$0xff] %v3455_v14  ;;  %5239 = vst [vmem:[#allocation14_spill] sm:$0xff] %v3465_v16  ;;  %v3470_v17 = vld [vmem:[%s5130_s11 + $0x80] sm:$0xff]  ;;  %v3475_v18 = vld [vmem:[%s5130_s11 + $0x88] sm:$0xff] }
   0x8   :  { %5240 = vst [vmem:[#allocation15_spill] sm:$0xff] %v3475_v18  ;;  %v3480_v19 = vld [vmem:[%s5130_s11 + $0x90] sm:$0xff]  ;;  %v3485_v20 = vld [vmem:[%s5130_s11 + $0x98] sm:$0xff]  ;;  %v3490_v21 = vld [vmem:[%s5130_s11 + $0xa0] sm:$0xff] }
   0x9   :  { %5241 = vst [vmem:[#allocation16_spill] sm:$0xff] %v3485_v20  ;;  %v3495_v22 = vld [vmem:[%s5130_s11 + $0xa8] sm:$0xff]  ;;  %v3500_v23 = vld [vmem:[%s5130_s11 + $0xb0] sm:$0xff]  ;;  %v3505_v24 = vld [vmem:[%s5130_s11 + $0xb8] sm:$0xff] }
   0xa   :  { %5242 = vst [vmem:[#allocation17_spill] sm:$0xff] %v3495_v22  ;;  %5243 = vst [vmem:[#allocation18_spill] sm:$0xff] %v3505_v24  ;;  %v3510_v25 = vld [vmem:[%s5130_s11 + $0xc0] sm:$0xff]  ;;  %v3515_v26 = vld [vmem:[%s5130_s11 + $0xc8] sm:$0xff] }
   0xb   :  { %5244 = vst [vmem:[#allocation19_spill] sm:$0xff] %v3515_v26  ;;  %v3520_v27 = vld [vmem:[%s5130_s11 + $0xd0] sm:$0xff]  ;;  %v3525_v28 = vld [vmem:[%s5130_s11 + $0xd8] sm:$0xff]  ;;  %v3530_v29 = vld [vmem:[%s5130_s11 + $0xe0] sm:$0xff] }
   0xc   :  { %5245 = vst [vmem:[#allocation20_spill] sm:$0xff] %v3525_v28  ;;  %v3535_v30 = vld [vmem:[%s5130_s11 + $0xe8] sm:$0xff]  ;;  %v3540_v31 = vld [vmem:[%s5130_s11 + $0xf0] sm:$0xff]  ;;  %v3545_v32 = vld [vmem:[%s5130_s11 + $0xf8] sm:$0xff] }
   0xd   :  { %5246 = vst [vmem:[#allocation21_spill] sm:$0xff] %v3535_v30  ;;  %5247 = vst [vmem:[#allocation22_spill] sm:$0xff] %v3545_v32  ;;  %v3550_v33 = vld [vmem:[%s5130_s11 + $0x100] sm:$0xff]  ;;  %v3555_v34 = vld [vmem:[%s5130_s11 + $0x108] sm:$0xff] }
   0xe   :  { %5248 = vst [vmem:[#allocation23_spill] sm:$0xff] %v3550_v33  ;;  %5249 = vst [vmem:[#allocation24_spill] sm:$0xff] %v3555_v34  ;;  %v3560_v35 = vld [vmem:[%s5130_s11 + $0x110] sm:$0xff]  ;;  %v3565_v36 = vld [vmem:[%s5130_s11 + $0x118] sm:$0xff] }
   0xf   :  { %5250 = vst [vmem:[#allocation25_spill] sm:$0xff] %v3560_v35  ;;  %5251 = vst [vmem:[#allocation26_spill] sm:$0xff] %v3565_v36  ;;  %v3570_v37 = vld [vmem:[%s5130_s11 + $0x120] sm:$0xff]  ;;  %v3575_v38 = vld [vmem:[%s5130_s11 + $0x128] sm:$0xff] }
  0x10   :  { %5252 = vst [vmem:[#allocation27_spill] sm:$0xff] %v3570_v37  ;;  %5253 = vst [vmem:[#allocation28_spill] sm:$0xff] %v3575_v38  ;;  %v3580_v39 = vld [vmem:[%s5130_s11 + $0x130] sm:$0xff]  ;;  %v3585_v40 = vld [vmem:[%s5130_s11 + $0x138] sm:$0xff] }
  0x11   :  { %5254 = vst [vmem:[#allocation29_spill] sm:$0xff] %v3580_v39  ;;  %5255 = vst [vmem:[#allocation30_spill] sm:$0xff] %v3585_v40  ;;  %v3590_v41 = vld [vmem:[%s5130_s11 + $0x140] sm:$0xff]  ;;  %v3595_v42 = vld [vmem:[%s5130_s11 + $0x148] sm:$0xff] }
  0x12   :  { %5256 = vst [vmem:[#allocation31_spill] sm:$0xff] %v3590_v41  ;;  %5257 = vst [vmem:[#allocation32_spill] sm:$0xff] %v3595_v42  ;;  %v3600_v43 = vld [vmem:[%s5130_s11 + $0x150] sm:$0xff]  ;;  %v3605_v44 = vld [vmem:[%s5130_s11 + $0x158] sm:$0xff] }
  0x13   :  { %5258 = vst [vmem:[#allocation33_spill] sm:$0xff] %v3600_v43  ;;  %5259 = vst [vmem:[#allocation34_spill] sm:$0xff] %v3605_v44  ;;  %v3610_v45 = vld [vmem:[%s5130_s11 + $0x160] sm:$0xff]  ;;  %v3615_v46 = vld [vmem:[%s5130_s11 + $0x168] sm:$0xff] }
  0x14   :  { %5260 = vst [vmem:[#allocation35_spill] sm:$0xff] %v3610_v45  ;;  %5261 = vst [vmem:[#allocation36_spill] sm:$0xff] %v3615_v46  ;;  %v3620_v47 = vld [vmem:[%s5130_s11 + $0x170] sm:$0xff]  ;;  %v3625_v48 = vld [vmem:[%s5130_s11 + $0x178] sm:$0xff] }
  0x15   :  { %5262 = vst [vmem:[#allocation37_spill] sm:$0xff] %v3620_v47  ;;  %5263 = vst [vmem:[#allocation38_spill] sm:$0xff] %v3625_v48  ;;  %v3630_v49 = vld [vmem:[%s5130_s11 + $0x180] sm:$0xff]  ;;  %v3635_v50 = vld [vmem:[%s5130_s11 + $0x188] sm:$0xff] }
  0x16   :  { %5264 = vst [vmem:[#allocation39_spill] sm:$0xff] %v3630_v49  ;;  %5265 = vst [vmem:[#allocation40_spill] sm:$0xff] %v3635_v50  ;;  %v3640_v51 = vld [vmem:[%s5130_s11 + $0x190] sm:$0xff]  ;;  %v3645_v52 = vld [vmem:[%s5130_s11 + $0x198] sm:$0xff] }
  0x17   :  { %5266 = vst [vmem:[#allocation41_spill] sm:$0xff] %v3640_v51  ;;  %5267 = vst [vmem:[#allocation42_spill] sm:$0xff] %v3645_v52  ;;  %v3650_v53 = vld [vmem:[%s5130_s11 + $0x1a0] sm:$0xff]  ;;  %v3655_v54 = vld [vmem:[%s5130_s11 + $0x1a8] sm:$0xff] }
  0x18   :  { %5268 = vst [vmem:[#allocation43_spill] sm:$0xff] %v3650_v53  ;;  %5269 = vst [vmem:[#allocation44_spill] sm:$0xff] %v3655_v54  ;;  %v3660_v55 = vld [vmem:[%s5130_s11 + $0x1b0] sm:$0xff]  ;;  %v3665_v56 = vld [vmem:[%s5130_s11 + $0x1b8] sm:$0xff] }
  0x19   :  { %5270 = vst [vmem:[#allocation45_spill] sm:$0xff] %v3660_v55  ;;  %5271 = vst [vmem:[#allocation46_spill] sm:$0xff] %v3665_v56  ;;  %v3670_v57 = vld [vmem:[%s5130_s11 + $0x1c0] sm:$0xff]  ;;  %v3675_v58 = vld [vmem:[%s5130_s11 + $0x1c8] sm:$0xff] }
  0x1a   :  { %5272 = vst [vmem:[#allocation47_spill] sm:$0xff] %v3670_v57  ;;  %5273 = vst [vmem:[#allocation48_spill] sm:$0xff] %v3675_v58  ;;  %v3680_v59 = vld [vmem:[%s5130_s11 + $0x1d0] sm:$0xff]  ;;  %v3685_v60 = vld [vmem:[%s5130_s11 + $0x1d8] sm:$0xff] }
  0x1b   :  { %5274 = vst [vmem:[#allocation49_spill] sm:$0xff] %v3680_v59  ;;  %5275 = vst [vmem:[#allocation50_spill] sm:$0xff] %v3685_v60  ;;  %v3690_v61 = vld [vmem:[%s5130_s11 + $0x1e0] sm:$0xff]  ;;  %v3695_v62 = vld [vmem:[%s5130_s11 + $0x1e8] sm:$0xff] }
  0x1c   :  { %5276 = vst [vmem:[#allocation51_spill] sm:$0xff] %v3690_v61  ;;  %5277 = vst [vmem:[#allocation52_spill] sm:$0xff] %v3695_v62  ;;  %v3700_v63 = vld [vmem:[%s5130_s11 + $0x1f0] sm:$0xff]  ;;  %v3705_v0 = vld [vmem:[%s5130_s11 + $0x1f8] sm:$0xff] }
  0x1d   :  { %5278 = vst [vmem:[#allocation53_spill] sm:$0xff] %v3705_v0  ;;  %v3710_v34 = vld [vmem:[%s5130_s11 + $0x200] sm:$0xff]  ;;  %v3715_v36 = vld [vmem:[%s5130_s11 + $0x208] sm:$0xff]  ;;  %v3720_v38 = vld [vmem:[%s5130_s11 + $0x210] sm:$0xff] }
  0x1e   :  { %5279 = vst [vmem:[#allocation54_spill] sm:$0xff] %v3715_v36  ;;  %v3725_v40 = vld [vmem:[%s5130_s11 + $0x218] sm:$0xff]  ;;  %v3730_v42 = vld [vmem:[%s5130_s11 + $0x220] sm:$0xff]  ;;  %v3735_v44 = vld [vmem:[%s5130_s11 + $0x228] sm:$0xff] }
  0x1f   :  { %5280 = vst [vmem:[#allocation55_spill] sm:$0xff] %v3725_v40  ;;  %5281 = vst [vmem:[#allocation56_spill] sm:$0xff] %v3735_v44  ;;  %v3740_v46 = vld [vmem:[%s5130_s11 + $0x230] sm:$0xff]  ;;  %v3745_v48 = vld [vmem:[%s5130_s11 + $0x238] sm:$0xff] }
  0x20   :  { %5282 = vst [vmem:[#allocation57_spill] sm:$0xff] %v3745_v48  ;;  %v3750_v50 = vld [vmem:[%s5130_s11 + $0x240] sm:$0xff]  ;;  %v3755_v52 = vld [vmem:[%s5130_s11 + $0x248] sm:$0xff]  ;;  %v3760_v54 = vld [vmem:[%s5130_s11 + $0x250] sm:$0xff] }
  0x21   :  { %5283 = vst [vmem:[#allocation58_spill] sm:$0xff] %v3755_v52  ;;  %v3765_v56 = vld [vmem:[%s5130_s11 + $0x258] sm:$0xff]  ;;  %v3770_v58 = vld [vmem:[%s5130_s11 + $0x260] sm:$0xff]  ;;  %v3775_v60 = vld [vmem:[%s5130_s11 + $0x268] sm:$0xff] }
  0x22   :  { %5284 = vst [vmem:[#allocation59_spill] sm:$0xff] %v3765_v56  ;;  %5285 = vst [vmem:[#allocation60_spill] sm:$0xff] %v3775_v60  ;;  %v3780_v62 = vld [vmem:[%s5130_s11 + $0x270] sm:$0xff]  ;;  %v3785_v0 = vld [vmem:[%s5130_s11 + $0x278] sm:$0xff] }
  0x23   :  { %5286 = vst [vmem:[#allocation61_spill] sm:$0xff] %v3785_v0  ;;  %v3790_v36 = vld [vmem:[%s5130_s11 + $0x280] sm:$0xff]  ;;  %v3795_v40 = vld [vmem:[%s5130_s11 + $0x288] sm:$0xff]  ;;  %v3800_v2 = vld [vmem:[%s5130_s11 + $0x290] sm:$0xff] }
  0x24   :  { %5287 = vst [vmem:[#allocation62_spill] sm:$0xff] %v3795_v40  ;;  %v3805_v4 = vld [vmem:[%s5130_s11 + $0x298] sm:$0xff]  ;;  %v3810_v44 = vld [vmem:[%s5130_s11 + $0x2a0] sm:$0xff]  ;;  %v3815_v48 = vld [vmem:[%s5130_s11 + $0x2a8] sm:$0xff] }
  0x25   :  { %5288 = vst [vmem:[#allocation63_spill] sm:$0xff] %v3805_v4  ;;  %5289 = vst [vmem:[#allocation64_spill] sm:$0xff] %v3815_v48  ;;  %v3820_v6 = vld [vmem:[%s5130_s11 + $0x2b0] sm:$0xff]  ;;  %v3825_v8 = vld [vmem:[%s5130_s11 + $0x2b8] sm:$0xff] }
  0x26   :  { %5290 = vst [vmem:[#allocation65_spill] sm:$0xff] %v3825_v8  ;;  %v3830_v52 = vld [vmem:[%s5130_s11 + $0x2c0] sm:$0xff]  ;;  %v3835_v56 = vld [vmem:[%s5130_s11 + $0x2c8] sm:$0xff]  ;;  %v3840_v10 = vld [vmem:[%s5130_s11 + $0x2d0] sm:$0xff] }
  0x27   :  { %5291 = vst [vmem:[#allocation66_spill] sm:$0xff] %v3835_v56  ;;  %v3845_v12 = vld [vmem:[%s5130_s11 + $0x2d8] sm:$0xff]  ;;  %v3850_v60 = vld [vmem:[%s5130_s11 + $0x2e0] sm:$0xff]  ;;  %v3855_v0 = vld [vmem:[%s5130_s11 + $0x2e8] sm:$0xff] }
  0x28   :  { %5292 = vst [vmem:[#allocation67_spill] sm:$0xff] %v3845_v12  ;;  %5293 = vst [vmem:[#allocation68_spill] sm:$0xff] %v3855_v0  ;;  %v3860_v14 = vld [vmem:[%s5130_s11 + $0x2f0] sm:$0xff]  ;;  %v3865_v16 = vld [vmem:[%s5130_s11 + $0x2f8] sm:$0xff] }
  0x29   :  { %5294 = vst [vmem:[#allocation69_spill] sm:$0xff] %v3865_v16  ;;  %v3870_v40 = vld [vmem:[%s5130_s11 + $0x300] sm:$0xff]  ;;  %v3875_v4 = vld [vmem:[%s5130_s11 + $0x308] sm:$0xff]  ;;  %v3880_v18 = vld [vmem:[%s5130_s11 + $0x310] sm:$0xff] }
  0x2a   :  { %5295 = vst [vmem:[#allocation70_spill] sm:$0xff] %v3870_v40  ;;  %5296 = vst [vmem:[#allocation71_spill] sm:$0xff] %v3875_v4  ;;  %v3885_v20 = vld [vmem:[%s5130_s11 + $0x318] sm:$0xff]  ;;  %v3890_v48 = vld [vmem:[%s5130_s11 + $0x320] sm:$0xff] }
  0x2b   :  { %5297 = vst [vmem:[#allocation72_spill] sm:$0xff] %v3880_v18  ;;  %5298 = vst [vmem:[#allocation73_spill] sm:$0xff] %v3885_v20  ;;  %v3895_v8 = vld [vmem:[%s5130_s11 + $0x328] sm:$0xff]  ;;  %v3900_v4 = vld [vmem:[%s5130_s11 + $0x330] sm:$0xff] }
  0x2c   :  { %5299 = vst [vmem:[#allocation74_spill] sm:$0xff] %v3890_v48  ;;  %5300 = vst [vmem:[#allocation75_spill] sm:$0xff] %v3895_v8  ;;  %v3905_v22 = vld [vmem:[%s5130_s11 + $0x338] sm:$0xff]  ;;  %v3910_v20 = vld [vmem:[%s5130_s11 + $0x340] sm:$0xff] }
  0x2d   :  { %5301 = vst [vmem:[#allocation76_spill] sm:$0xff] %v3900_v4  ;;  %5302 = vst [vmem:[#allocation77_spill] sm:$0xff] %v3905_v22  ;;  %v3915_v24 = vld [vmem:[%s5130_s11 + $0x348] sm:$0xff]  ;;  %v3920_v8 = vld [vmem:[%s5130_s11 + $0x350] sm:$0xff] }
  0x2e   :  { %5303 = vst [vmem:[#allocation78_spill] sm:$0xff] %v3910_v20  ;;  %5304 = vst [vmem:[#allocation79_spill] sm:$0xff] %v3915_v24  ;;  %v3925_v56 = vld [vmem:[%s5130_s11 + $0x358] sm:$0xff]  ;;  %v3930_v22 = vld [vmem:[%s5130_s11 + $0x360] sm:$0xff] }
  0x2f   :  { %5305 = vst [vmem:[#allocation80_spill] sm:$0xff] %v3920_v8  ;;  %5306 = vst [vmem:[#allocation81_spill] sm:$0xff] %v3925_v56  ;;  %v3935_v12 = vld [vmem:[%s5130_s11 + $0x368] sm:$0xff]  ;;  %v3940_v24 = vld [vmem:[%s5130_s11 + $0x370] sm:$0xff] }
  0x30   :  { %5307 = vst [vmem:[#allocation82_spill] sm:$0xff] %v3930_v22  ;;  %5308 = vst [vmem:[#allocation83_spill] sm:$0xff] %v3935_v12  ;;  %v3945_v26 = vld [vmem:[%s5130_s11 + $0x378] sm:$0xff]  ;;  %v3950_v56 = vld [vmem:[%s5130_s11 + $0x380] sm:$0xff] }
  0x31   :  { %5309 = vst [vmem:[#allocation84_spill] sm:$0xff] %v3940_v24  ;;  %5310 = vst [vmem:[#allocation85_spill] sm:$0xff] %v3945_v26  ;;  %v3955_v28 = vld [vmem:[%s5130_s11 + $0x388] sm:$0xff]  ;;  %v3960_v12 = vld [vmem:[%s5130_s11 + $0x390] sm:$0xff] }
  0x32   :  { %5311 = vst [vmem:[#allocation86_spill] sm:$0xff] %v3950_v56  ;;  %5312 = vst [vmem:[#allocation87_spill] sm:$0xff] %v3955_v28  ;;  %v3965_v0 = vld [vmem:[%s5130_s11 + $0x398] sm:$0xff]  ;;  %v3970_v26 = vld [vmem:[%s5130_s11 + $0x3a0] sm:$0xff] }
  0x33   :  { %5313 = vst [vmem:[#allocation88_spill] sm:$0xff] %v3960_v12  ;;  %5314 = vst [vmem:[#allocation89_spill] sm:$0xff] %v3965_v0  ;;  %v3975_v16 = vld [vmem:[%s5130_s11 + $0x3a8] sm:$0xff]  ;;  %v3980_v28 = vld [vmem:[%s5130_s11 + $0x3b0] sm:$0xff] }
  0x34   :  { %5315 = vst [vmem:[#allocation90_spill] sm:$0xff] %v3970_v26  ;;  %5316 = vst [vmem:[#allocation91_spill] sm:$0xff] %v3975_v16  ;;  %v3985_v30 = vld [vmem:[%s5130_s11 + $0x3b8] sm:$0xff]  ;;  %v3990_v0 = vld [vmem:[%s5130_s11 + $0x3c0] sm:$0xff] }
  0x35   :  { %5317 = vst [vmem:[#allocation92_spill] sm:$0xff] %v3980_v28  ;;  %5318 = vst [vmem:[#allocation93_spill] sm:$0xff] %v3985_v30  ;;  %v3995_v32 = vld [vmem:[%s5130_s11 + $0x3c8] sm:$0xff]  ;;  %v4000_v16 = vld [vmem:[%s5130_s11 + $0x3d0] sm:$0xff] }
  0x36   :  { %5319 = vst [vmem:[#allocation94_spill] sm:$0xff] %v3990_v0  ;;  %5320 = vst [vmem:[#allocation95_spill] sm:$0xff] %v3995_v32  ;;  %v4005_v40 = vld [vmem:[%s5130_s11 + $0x3d8] sm:$0xff]  ;;  %v4010_v30 = vld [vmem:[%s5130_s11 + $0x3e0] sm:$0xff] }
  0x37   :  { %5321 = vst [vmem:[#allocation96_spill] sm:$0xff] %v4000_v16  ;;  %5322 = vst [vmem:[#allocation97_spill] sm:$0xff] %v4005_v40  ;;  %v4015_v18 = vld [vmem:[%s5130_s11 + $0x3e8] sm:$0xff]  ;;  %v4020_v32 = vld [vmem:[%s5130_s11 + $0x3f0] sm:$0xff] }
  0x38   :  { %5323 = vst [vmem:[#allocation98_spill] sm:$0xff] %v4010_v30  ;;  %5324 = vst [vmem:[#allocation99_spill] sm:$0xff] %v4015_v18  ;;  %v4025_v33 = vld [vmem:[%s5130_s11 + $0x3f8] sm:$0xff] }
  0x39   :  { %5325 = vst [vmem:[#allocation100_spill] sm:$0xff] %v4020_v32  ;;  %5326 = vst [vmem:[#allocation101_spill] sm:$0xff] %v4025_v33 }
  0x3a   :  { %346 = vsyncadd [#allocation3], 16384  ;;  %v380_v40 = vld [vmem:[%s5120_s1 + $0xf8] sm:$0xff]  ;;  %v379_v18 = vld [vmem:[%s5120_s1 + $0xf0] sm:$0xff]  ;;  %v458_v41 = vlaneseq  ;;  %vm711_vm0 = vcmask 1042432   ;;  %vm707_vm1 = vcmask 23552  }
  0x3b   :  { %v364_v35 = vld [vmem:[%s5120_s1 + $0x78] sm:$0xff]  ;;  %3021 = vmatprep.subr.mxu0 %v380_v40  ;;  %v363_v33 = vld [vmem:[%s5120_s1 + $0x70] sm:$0xff]  ;;  %v378_v40 = vld [vmem:[%s5120_s1 + $0xe8] sm:$0xff]  ;;  %vm1017_vm2 = vcmask 64512   ;;  %vm1431_vm3 = vcmask 1041408   ;;  %vm1427_vm4 = vcmask 15360  }
  0x3c   :  { %v412_v48 = vld [vmem:[%s5120_s1 + $0x1f8] sm:$0xff]  ;;  %3022 = vmatpush3.msra.mxu0 %v364_v35  ;;  %v411_v37 = vld [vmem:[%s5120_s1 + $0x1f0] sm:$0xff]  ;;  %v362_v39 = vld [vmem:[%s5120_s1 + $0x68] sm:$0xff] }
  0x3d   :  { %3056 = vmatprep.subr.mxu1 %v412_v48  ;;  %v396_v4 = vld [vmem:[%s5120_s1 + $0x178] sm:$0xff]  ;;  %3023 = vmatprep.subr.mxu0 %v379_v18  ;;  %v395_v35 = vld [vmem:[%s5120_s1 + $0x170] sm:$0xff]  ;;  %v377_v48 = vld [vmem:[%s5120_s1 + $0xe0] sm:$0xff] }
  0x3e   :  { %3057 = vmatpush3.msra.mxu1 %v396_v4  ;;  %3024 = vmatpush3.msra.mxu0 %v363_v33  ;;  %v410_v20 = vld [vmem:[%s5120_s1 + $0x1e8] sm:$0xff]  ;;  %v361_v18 = vld [vmem:[%s5120_s1 + $0x60] sm:$0xff]  ;;  %v371_v22 = vld [vmem:[%s5120_s1 + $0xb0] sm:$0xff] }
  0x3f   :  { %3058 = vmatprep.subr.mxu1 %v411_v37  ;;  %v394_v4 = vld [vmem:[%s5120_s1 + $0x168] sm:$0xff]  ;;  %3025 = vmatprep.subr.mxu0 %v378_v40  ;;  %v409_v33 = vld [vmem:[%s5120_s1 + $0x1e0] sm:$0xff]  ;;  %v376_v37 = vld [vmem:[%s5120_s1 + $0xd8] sm:$0xff] }
  0x40   :  { %3059 = vmatpush3.msra.mxu1 %v395_v35  ;;  %3026 = vmatpush3.msra.mxu0 %v362_v39  ;;  %v393_v8 = vld [vmem:[%s5120_s1 + $0x160] sm:$0xff]  ;;  %v360_v40 = vld [vmem:[%s5120_s1 + $0x58] sm:$0xff]  ;;  %v367_v24 = vld [vmem:[%s5120_s1 + $0x90] sm:$0xff] }
  0x41   :  { %3060 = vmatprep.subr.mxu1 %v410_v20  ;;  %3027 = vmatprep.subr.mxu0 %v377_v48  ;;  %v408_v35 = vld [vmem:[%s5120_s1 + $0x1d8] sm:$0xff]  ;;  %v375_v20 = vld [vmem:[%s5120_s1 + $0xd0] sm:$0xff]  ;;  %v373_v43 = vld [vmem:[%s5120_s1 + $0xc0] sm:$0xff] }
  0x42   :  { %3061 = vmatpush3.msra.mxu1 %v394_v4  ;;  %3028 = vmatpush3.msra.mxu0 %v361_v18  ;;  %v392_v39 = vld [vmem:[%s5120_s1 + $0x158] sm:$0xff]  ;;  %v359_v48 = vld [vmem:[%s5120_s1 + $0x50] sm:$0xff]  ;;  %v374_v18 = vld [vmem:[%s5120_s1 + $0xc8] sm:$0xff] }
  0x43   :  { %3062 = vmatprep.subr.mxu1 %v409_v33  ;;  %3029 = vmatprep.subr.mxu0 %v376_v37  ;;  %v407_v4 = vld [vmem:[%s5120_s1 + $0x1d0] sm:$0xff]  ;;  %v406_v37 = vld [vmem:[%s5120_s1 + $0x1c8] sm:$0xff]  ;;  %v365_v45 = vld [vmem:[%s5120_s1 + $0x80] sm:$0xff] }
  0x44   :  { %3063 = vmatpush3.msra.mxu1 %v393_v8  ;;  %3030 = vmatpush3.msra.mxu0 %v360_v40  ;;  %v391_v33 = vld [vmem:[%s5120_s1 + $0x150] sm:$0xff]  ;;  %v358_v8 = vld [vmem:[%s5120_s1 + $0x48] sm:$0xff]  ;;  %v3301_v40 = vmov 1983009808  }
  0x45   :  { %3064 = vmatprep.subr.mxu1 %v408_v35  ;;  %3031 = vmatprep.subr.mxu0 %v375_v20  ;;  %v456_v35 = vunpack.c.l.s4 %v3301_v40  ;;  %v390_v20 = vld [vmem:[%s5120_s1 + $0x148] sm:$0xff]  ;;  %v405_v40 = vld [vmem:[%s5120_s1 + $0x1c0] sm:$0xff] }
  0x46   :  { %3065 = vmatpush3.msra.mxu1 %v392_v39  ;;  %3032 = vmatpush3.msra.mxu0 %v359_v48  ;;  %v357_v39 = vld [vmem:[%s5120_s1 + $0x40] sm:$0xff]  ;;  %v372_v48 = vld [vmem:[%s5120_s1 + $0xb8] sm:$0xff] }
  0x47   :  { %3066 = vmatprep.subr.mxu1 %v407_v4  ;;  %3033 = vmatprep.subr.mxu0 %v374_v18  ;;  %v389_v4 = vld [vmem:[%s5120_s1 + $0x140] sm:$0xff]  ;;  %v356_v18 = vld [vmem:[%s5120_s1 + $0x38] sm:$0xff] }
  0x48   :  { %3067 = vmatpush3.msra.mxu1 %v391_v33  ;;  %3034 = vmatpush3.msra.mxu0 %v358_v8  ;;  %v404_v33 = vld [vmem:[%s5120_s1 + $0x1b8] sm:$0xff]  ;;  %v457_v8 = vunpack.c.0.s8 %v456_v35  ;;  %v370_v35 = vld [vmem:[%s5120_s1 + $0xa8] sm:$0xff] }
  0x49   :  { %3068 = vmatprep.subr.mxu1 %v406_v37  ;;  %3035 = vmatprep.subr.mxu0 %v373_v43  ;;  %v4132_v37 = vshrl.u32 %v458_v41, 7  ;;  %v388_v43 = vld [vmem:[%s5120_s1 + $0x138] sm:$0xff]  ;;  %v403_v41 = vld [vmem:[%s5120_s1 + $0x1b0] sm:$0xff] }
  0x4a   :  { %3069 = vmatpush3.msra.mxu1 %v390_v20  ;;  %3036 = vmatpush3.msra.mxu0 %v357_v39  ;;  %v355_v20 = vld [vmem:[%s5120_s1 + $0x30] sm:$0xff] }
  0x4b   :  { %3070 = vmatprep.subr.mxu1 %v405_v40  ;;  %3037 = vmatprep.subr.mxu0 %v372_v48  ;;  %v387_v39 = vld [vmem:[%s5120_s1 + $0x130] sm:$0xff]  ;;  %v354_v40 = vld [vmem:[%s5120_s1 + $0x28] sm:$0xff]  ;;  %v4596_v51 = vsub.s32 3, %v4132_v37 }
  0x4c   :  { %3071 = vmatpush3.msra.mxu1 %v389_v4  ;;  %3038 = vmatpush3.msra.mxu0 %v356_v18  ;;  %v402_v48 = vld [vmem:[%s5120_s1 + $0x1a8] sm:$0xff]  ;;  %v4159_v4 = vsub.s32 %v457_v8, %v4132_v37  ;;  %v369_v18 = vld [vmem:[%s5120_s1 + $0xa0] sm:$0xff] }
  0x4d   :  { %3072 = vmatprep.subr.mxu1 %v404_v33  ;;  %3039 = vmatprep.subr.mxu0 %v371_v22  ;;  %v386_v22 = vld [vmem:[%s5120_s1 + $0x128] sm:$0xff]  ;;  %v347_v33 = vld [vmem:[%s5119_s0] sm:$0xff] }
  0x4e   :  { %3073 = vmatpush3.msra.mxu1 %v388_v43  ;;  %3040 = vmatpush3.msra.mxu0 %v355_v20  ;;  %v353_v8 = vld [vmem:[%s5120_s1 + $0x20] sm:$0xff]  ;;  %v368_v20 = vld [vmem:[%s5120_s1 + $0x98] sm:$0xff] }
  0x4f   :  { %3074 = vmatprep.subr.mxu1 %v403_v41  ;;  %3041 = vmatprep.subr.mxu0 %v370_v35  ;;  %v401_v43 = vld [vmem:[%s5120_s1 + $0x1a0] sm:$0xff]  ;;  %v352_v35 = vld [vmem:[%s5120_s1 + $0x18] sm:$0xff] }
  0x50   :  { %3075 = vmatpush3.msra.mxu1 %v387_v39  ;;  %3042 = vmatpush3.msra.mxu0 %v354_v40  ;;  %v385_v41 = vld [vmem:[%s5120_s1 + $0x120] sm:$0xff]  ;;  %v400_v39 = vld [vmem:[%s5120_s1 + $0x198] sm:$0xff]  ;;  %v461_v40 = vrot.slane %v347_v33, %v4159_v4 }
  0x51   :  { %3076 = vmatprep.subr.mxu1 %v402_v48  ;;  %3043 = vmatprep.subr.mxu0 %v369_v18  ;;  %v454_v48 = vcombine.high %v347_v33, %v347_v33  ;;  %v384_v18 = vld [vmem:[%s5120_s1 + $0x118] sm:$0xff]  ;;  %v399_v33 = vld [vmem:[%s5120_s1 + $0x190] sm:$0xff] }
  0x52   :  { %3077 = vmatpush3.msra.mxu1 %v386_v22  ;;  %3044 = vmatpush3.msra.mxu0 %v353_v8  ;;  %v351_v22 = vld [vmem:[%s5120_s1 + $0x10] sm:$0xff]  ;;  %v366_v8 = vld [vmem:[%s5120_s1 + $0x88] sm:$0xff] }
  0x53   :  { %3078 = vmatprep.subr.mxu1 %v401_v43  ;;  %3045 = vmatprep.subr.mxu0 %v368_v20  ;;  %v383_v43 = vld [vmem:[%s5120_s1 + $0x110] sm:$0xff]  ;;  %v350_v20 = vld [vmem:[%s5120_s1 + $0x8] sm:$0xff] }
  0x54   :  { %3079 = vmatpush3.msra.mxu1 %v385_v41  ;;  %3046 = vmatpush3.msra.mxu0 %v352_v35  ;;  %v398_v41 = vld [vmem:[%s5120_s1 + $0x188] sm:$0xff]  ;;  %v469_v35 = vcombine.high %v461_v40, %v461_v40 }
  0x55   :  { %3080 = vmatprep.subr.mxu1 %v400_v39  ;;  %3047 = vmatprep.subr.mxu0 %v367_v24  ;;  %v468_v39 = vrot.slane %v454_v48, %v4159_v4  ;;  %v349_v24 = vld [vmem:[%s5120_s1] sm:$0xff] }
  0x56   :  { %3081 = vmatpush3.msra.mxu1 %v384_v18  ;;  %3048 = vmatpush3.msra.mxu0 %v351_v22  ;;  %v382_v18 = vld [vmem:[%s5120_s1 + $0x108] sm:$0xff]  ;;  %v397_v48 = vld [vmem:[%s5120_s1 + $0x180] sm:$0xff]  ;;  %v444_v22 = vld [vmem:[%s5120_s1 + $0x2f8] sm:$0xff] }
  0x57   :  { %3082 = vmatprep.subr.mxu1 %v399_v33  ;;  %3049 = vmatprep.subr.mxu0 %v366_v8  ;;  %v381_v33 = vld [vmem:[%s5120_s1 + $0x100] sm:$0xff]  ;;  %v470_v8 = vcombine.high %v468_v39, %v468_v39 }
  0x58   :  { %3083 = vmatpush3.msra.mxu1 %v383_v43  ;;  %3050 = vmatpush3.msra.mxu0 %v350_v20  ;;  %v428_v43 = vld [vmem:[%s5120_s1 + $0x278] sm:$0xff]  ;;  %v443_v20 = vld [vmem:[%s5120_s1 + $0x2f0] sm:$0xff] }
  0x59   :  { %3084 = vmatprep.subr.mxu1 %v398_v41  ;;  %3051 = vmatprep.subr.mxu0 %v365_v45  ;;  %v4238_v45 = vld.sshfl [vmem:[%s5119_s0 + $0x8] sm:$0x33 pattern:$0x76325410] }
  0x5a   :  { %549 = vmatprep.mubr.f32.mxu0 %v469_v35  ;;  %3052 = vmatpush3.msra.mxu0 %v349_v24  ;;  %v478_v41 = vcombine.high %v4238_v45, %v4238_v45  ;;  %v427_v35 = vld [vmem:[%s5120_s1 + $0x270] sm:$0xff]  ;;  %v426_v24 = vld [vmem:[%s5120_s1 + $0x268] sm:$0xff] }
  0x5b   :  { %3085 = vmatpush3.msra.mxu1 %v382_v18  ;;  %550 = vmatmul.mubr.f32.vlgmr.msra.gmra.mxu0 %v461_v40  ;;  %v442_v40 = vld [vmem:[%s5120_s1 + $0x2e8] sm:$0xff]  ;;  %v441_v18 = vld [vmem:[%s5120_s1 + $0x2e0] sm:$0xff] }
  0x5c   :  { %3086 = vmatprep.subr.mxu1 %v397_v48  ;;  %3091 = vmatprep.subr.mxu0 %v444_v22  ;;  %v425_v48 = vld [vmem:[%s5120_s1 + $0x260] sm:$0xff]  ;;  %v424_v22 = vld [vmem:[%s5120_s1 + $0x258] sm:$0xff] }
  0x5d   :  { %3087 = vmatpush3.msra.mxu1 %v381_v33  ;;  %619 = vmatprep.mubr.f32.mxu1 %v470_v8  ;;  %v439_v33 = vld [vmem:[%s5120_s1 + $0x2d0] sm:$0xff] }
  0x5e   :  { %3092 = vmatpush3.msra.mxu0 %v428_v43  ;;  %620 = vmatmul.mubr.f32.vlgmr.msra.gmra.mxu1 %v468_v39  ;;  %v440_v39 = vld [vmem:[%s5120_s1 + $0x2d8] sm:$0xff]  ;;  %v423_v8 = vld [vmem:[%s5120_s1 + $0x250] sm:$0xff]  ;;  %v438_v43 = vld [vmem:[%s5120_s1 + $0x2c8] sm:$0xff] }
  0x5f   :  { %3093 = vmatprep.subr.mxu0 %v443_v20  ;;  %689 = vmatprep.mubr.f32.mxu0 %v478_v41  ;;  %v422_v20 = vld [vmem:[%s5120_s1 + $0x248] sm:$0xff]  ;;  %v437_v41 = vld [vmem:[%s5120_s1 + $0x2c0] sm:$0xff] }
  0x60   :  { %3094 = vmatpush3.msra.mxu0 %v427_v35  ;;  %v421_v35 = vld [vmem:[%s5120_s1 + $0x240] sm:$0xff] }
  0x61   :  { %3095 = vmatprep.subr.mxu0 %v442_v40  ;;  %v436_v40 = vld [vmem:[%s5120_s1 + $0x2b8] sm:$0xff] }
  0x62   :  { %3096 = vmatpush3.msra.mxu0 %v426_v24  ;;  %v420_v24 = vld [vmem:[%s5120_s1 + $0x238] sm:$0xff] }
  0x63   :  { %3097 = vmatprep.subr.mxu0 %v441_v18  ;;  %v435_v18 = vld [vmem:[%s5120_s1 + $0x2b0] sm:$0xff] }
  0x64   :  { %3098 = vmatpush3.msra.mxu0 %v425_v48  ;;  %v419_v48 = vld [vmem:[%s5120_s1 + $0x230] sm:$0xff] }
  0x65   :  { %3099 = vmatprep.subr.mxu0 %v440_v39  ;;  %v434_v39 = vld [vmem:[%s5120_s1 + $0x2a8] sm:$0xff] }
  0x66   :  { %3100 = vmatpush3.msra.mxu0 %v424_v22  ;;  %v418_v22 = vld [vmem:[%s5120_s1 + $0x228] sm:$0xff] }
  0x67   :  { %3101 = vmatprep.subr.mxu0 %v439_v33  ;;  %v433_v33 = vld [vmem:[%s5120_s1 + $0x2a0] sm:$0xff] }
  0x68   :  { %3102 = vmatpush3.msra.mxu0 %v423_v8  ;;  %v417_v8 = vld [vmem:[%s5120_s1 + $0x220] sm:$0xff] }
  0x69   :  { %3103 = vmatprep.subr.mxu0 %v438_v43  ;;  %v432_v43 = vld [vmem:[%s5120_s1 + $0x298] sm:$0xff] }
  0x6a   :  { %3104 = vmatpush3.msra.mxu0 %v422_v20  ;;  %v416_v20 = vld [vmem:[%s5120_s1 + $0x218] sm:$0xff] }
  0x6b   :  { %3105 = vmatprep.subr.mxu0 %v437_v41  ;;  %v431_v41 = vld [vmem:[%s5120_s1 + $0x290] sm:$0xff] }
  0x6c   :  { %3106 = vmatpush3.msra.mxu0 %v421_v35  ;;  %v415_v35 = vld [vmem:[%s5120_s1 + $0x210] sm:$0xff] }
  0x6d   :  { %3107 = vmatprep.subr.mxu0 %v436_v40  ;;  %v430_v40 = vld [vmem:[%s5120_s1 + $0x288] sm:$0xff] }
  0x6e   :  { %3108 = vmatpush3.msra.mxu0 %v420_v24  ;;  %v414_v24 = vld [vmem:[%s5120_s1 + $0x208] sm:$0xff] }
  0x6f   :  { %3109 = vmatprep.subr.mxu0 %v435_v18  ;;  %v429_v18 = vld [vmem:[%s5120_s1 + $0x280] sm:$0xff] }
  0x70   :  { %3110 = vmatpush3.msra.mxu0 %v419_v48  ;;  %v413_v48 = vld [vmem:[%s5120_s1 + $0x200] sm:$0xff] }
  0x71   :  { %3111 = vmatprep.subr.mxu0 %v434_v39  ;;  %v695_v39 = vld [vmem:[%s5122_s3] sm:$0x77] }
  0x72   :  { %3112 = vmatpush3.msra.mxu0 %v418_v22  ;;  %v703_v22 = vcombine.high %v695_v39, %v695_v39 }
  0x73   :  { %3113 = vmatprep.subr.mxu0 %v433_v33  ;;  %v696_v33 = vld [vmem:[%s5122_s3 + $0x8] sm:$0x77] }
  0x74   :  { %3114 = vmatpush3.msra.mxu0 %v417_v8  ;;  %2862 = vmatprep.subr.msk.mxu1 %vm711_vm0, %v703_v22  ;;  %v5215_v8 = vmov 0.0  }
  0x75   :  { %3115 = vmatprep.subr.mxu0 %v432_v43  ;;  %2863 = vmatpush1.msk.msra.mxu1 %vm711_vm0, %v695_v39  ;;  %v704_v43 = vcombine.high %v696_v33, %v696_v33  ;;  %v697_v39 = vld [vmem:[%s5122_s3 + $0x10] sm:$0x77] }
  0x76   :  { %3116 = vmatpush3.msra.mxu0 %v416_v20  ;;  %792 = vmatprep.mubr.f32.mxu1 %v5215_v8  ;;  %v705_v12 = vcombine.high %v697_v39, %v697_v39 }
  0x77   :  { %3117 = vmatprep.subr.mxu0 %v431_v41  ;;  %2865 = vmatprep.subr.msk.mxu1 %vm711_vm0, %v704_v43 }
  0x78   :  { %3118 = vmatpush3.msra.mxu0 %v415_v35 }
  0x79   :  { %3119 = vmatprep.subr.mxu0 %v430_v40  ;;  %v2860_v40 = vld [vmem:[%s5121_s2] ss:$0 sm:$0xff] }
  0x7a   :  { %3120 = vmatpush3.msra.mxu0 %v414_v24 }
  0x7b   :  { %3121 = vmatprep.subr.mxu0 %v429_v18 }
  0x7c   :  { %3122 = vmatpush3.msra.mxu0 %v413_v48 }
  0x7d   :  { %690 = vmatmul.mubr.f32.vlgmr.msra.gmra.mxu0 %v4238_v45 }
 0x11b   :  { %v3053_v45 = vpop.f32.mrf.mxu0 }
 0x11d   :  { %v3054_v20 = vpop.f32.mrf.mxu0 }
 0x11e   :  { %v3088_v41 = vpop.f32.mrf.mxu1  ;;  %v3055_v35 = vadd.f32 %v3054_v20, %v3053_v45  ;;  %v698_v45 = vld [vmem:[%s5122_s3 + $0x18] sm:$0x77]  ;;  %v5327_v20 = vmov 0.0  }
 0x120   :  { %v3089_v24 = vpop.f32.mrf.mxu1  ;;  %v552_v18 = vadd.f32 %v3055_v35, %v2860_v40  ;;  %v1228_v35 = vld [vmem:[%s5126_s7 + $0xf8] sm:$0xff] }
 0x121   :  { %v3090_v48 = vadd.f32 %v3089_v24, %v3088_v41  ;;  %v706_v41 = vcombine.high %v698_v45, %v698_v45  ;;  %v1212_v40 = vld [vmem:[%s5126_s7 + $0x78] sm:$0xff]  ;;  %v1227_v24 = vld [vmem:[%s5126_s7 + $0xf0] sm:$0xff] }
 0x123   :  { %v622_v8 = vadd.f32 %v3090_v48, %v552_v18  ;;  %v1211_v18 = vld [vmem:[%s5126_s7 + $0x70] sm:$0xff]  ;;  %v1226_v48 = vld [vmem:[%s5126_s7 + $0xe8] sm:$0xff] }
 0x13d   :  { %v3123_v22 = vpop.f32.mrf.mxu0 }
 0x13f   :  { %v3124_v47 = vpop.f32.mrf.mxu0 }
 0x140   :  { %v3125_v56 = vadd.f32 %v3124_v47, %v3123_v22  ;;  %v1014_v47 = vld [vmem:[%s5124_s5 + $0x8] sm:$0xff]  ;;  %v1260_v22 = vld [vmem:[%s5126_s7 + $0x1f8] sm:$0xff] }
 0x141   :  { %3161 = vmatprep.subr.mxu0 %v1260_v22  ;;  %v1222_v22 = vld [vmem:[%s5126_s7 + $0xc8] sm:$0xff] }
 0x142   :  { %v692_v43 = vadd.f32 %v3125_v56, %v622_v8  ;;  %v1016_v56 = vld [vmem:[%s5124_s5 + $0x18] sm:$0xff]  ;;  %v1015_v8 = vld [vmem:[%s5124_s5 + $0x10] sm:$0xff] }
 0x144   :  { %2864 = vmatmul.mubr.msk.f32.vlgmr.msra.gmra.mxu1 %vm707_vm1, %v692_v43 }
 0x145   :  { %2866 = vmatpush1.msk.msra.mxu1 %vm711_vm0, %v696_v33  ;;  %863 = vmatprep.mubr.f32.mxu1 %v5327_v20  ;;  %v1012_v33 = vld [vmem:[%s5123_s4] sm:$0x3] }
 0x146   :  { %2868 = vmatprep.subr.msk.mxu1 %vm711_vm0, %v705_v12  ;;  %v1013_v12 = vld [vmem:[%s5124_s5] sm:$0xff] }
 0x148   :  { %2867 = vmatmul.mubr.msk.f32.vlgmr.msra.gmra.mxu1 %vm707_vm1, %v692_v43 }
 0x149   :  { %2869 = vmatpush1.msk.msra.mxu1 %vm711_vm0, %v697_v39  ;;  %934 = vmatprep.mubr.f32.mxu1 %v5327_v20  ;;  %v1210_v39 = vld [vmem:[%s5126_s7 + $0x68] sm:$0xff] }
 0x14a   :  { %2871 = vmatprep.subr.msk.mxu1 %vm711_vm0, %v706_v41  ;;  %v1259_v41 = vld [vmem:[%s5126_s7 + $0x1f0] sm:$0xff] }
 0x14c   :  { %2870 = vmatmul.mubr.msk.f32.vlgmr.msra.gmra.mxu1 %vm707_vm1, %v692_v43 }
 0x14d   :  { %2872 = vmatpush1.msk.msra.mxu1 %vm711_vm0, %v698_v45  ;;  %1005 = vmatprep.mubr.f32.mxu1 %v5327_v20  ;;  %v1225_v45 = vld [vmem:[%s5126_s7 + $0xe0] sm:$0xff] }
 0x14e   :  { %1051 = vmatprep.subr.mxu1 %v1014_v47  ;;  %v1209_v47 = vld [vmem:[%s5126_s7 + $0x60] sm:$0xff] }
 0x150   :  { %2873 = vmatmul.mubr.msk.f32.vlgmr.msra.gmra.mxu1 %vm707_vm1, %v692_v43  ;;  %v1244_v43 = vld [vmem:[%s5126_s7 + $0x178] sm:$0xff] }
 0x151   :  { %1052 = vmatpush1.msra.mxu1 %v1013_v12  ;;  %1085 = vmatprep.mubr.f32.mxu1 %v5327_v20  ;;  %v1243_v12 = vld [vmem:[%s5126_s7 + $0x170] sm:$0xff] }
 0x152   :  { %1122 = vmatprep.subr.mxu1 %v1016_v56  ;;  %3162 = vmatpush3.msra.mxu0 %v1244_v43  ;;  %v1224_v56 = vld [vmem:[%s5126_s7 + $0xd8] sm:$0xff]  ;;  %v1206_v43 = vld [vmem:[%s5126_s7 + $0x48] sm:$0xff] }
 0x153   :  { %3163 = vmatprep.subr.mxu0 %v1259_v41  ;;  %v1221_v41 = vld [vmem:[%s5126_s7 + $0xc0] sm:$0xff] }
 0x154   :  { %2874 = vmatmul.mubr.msk.f32.vlgmr.msra.gmra.mxu1 %vm1017_vm2, %v1012_v33  ;;  %3164 = vmatpush3.msra.mxu0 %v1243_v12  ;;  %v1205_v12 = vld [vmem:[%s5126_s7 + $0x40] sm:$0xff] }
 0x155   :  { %1123 = vmatpush1.msra.mxu1 %v1015_v8  ;;  %1156 = vmatprep.mubr.f32.mxu1 %v5327_v20  ;;  %v1208_v8 = vld [vmem:[%s5126_s7 + $0x58] sm:$0xff] }
 0x156   :  { %3126 = vmatprep.subr.mxu1 %v1228_v35  ;;  %v1242_v35 = vld [vmem:[%s5126_s7 + $0x168] sm:$0xff] }
 0x158   :  { %2875 = vmatmul.mubr.msk.f32.vlgmr.msra.gmra.mxu1 %vm1017_vm2, %v1012_v33  ;;  %v1258_v33 = vld [vmem:[%s5126_s7 + $0x1e8] sm:$0xff] }
 0x159   :  { %3127 = vmatpush3.msra.mxu1 %v1212_v40  ;;  %3165 = vmatprep.subr.mxu0 %v1258_v33  ;;  %v1223_v40 = vld [vmem:[%s5126_s7 + $0xd0] sm:$0xff]  ;;  %v1220_v33 = vld [vmem:[%s5126_s7 + $0xb8] sm:$0xff] }
 0x15a   :  { %3128 = vmatprep.subr.mxu1 %v1227_v24  ;;  %3166 = vmatpush3.msra.mxu0 %v1242_v35  ;;  %v1257_v24 = vld [vmem:[%s5126_s7 + $0x1e0] sm:$0xff]  ;;  %v1204_v35 = vld [vmem:[%s5126_s7 + $0x38] sm:$0xff] }
 0x15b   :  { %3129 = vmatpush3.msra.mxu1 %v1211_v18  ;;  %3167 = vmatprep.subr.mxu0 %v1257_v24  ;;  %v1207_v18 = vld [vmem:[%s5126_s7 + $0x50] sm:$0xff] }
 0x15c   :  { %3130 = vmatprep.subr.mxu1 %v1226_v48  ;;  %v1241_v48 = vld [vmem:[%s5126_s7 + $0x160] sm:$0xff]  ;;  %v1219_v24 = vld [vmem:[%s5126_s7 + $0xb0] sm:$0xff] }
 0x15d   :  { %3131 = vmatpush3.msra.mxu1 %v1210_v39  ;;  %3168 = vmatpush3.msra.mxu0 %v1241_v48  ;;  %v1256_v39 = vld [vmem:[%s5126_s7 + $0x1d8] sm:$0xff]  ;;  %v1203_v48 = vld [vmem:[%s5126_s7 + $0x30] sm:$0xff] }
 0x15e   :  { %3132 = vmatprep.subr.mxu1 %v1225_v45  ;;  %3169 = vmatprep.subr.mxu0 %v1256_v39  ;;  %v1240_v45 = vld [vmem:[%s5126_s7 + $0x158] sm:$0xff]  ;;  %v1218_v39 = vld [vmem:[%s5126_s7 + $0xa8] sm:$0xff] }
 0x15f   :  { %3133 = vmatpush3.msra.mxu1 %v1209_v47  ;;  %3170 = vmatpush3.msra.mxu0 %v1240_v45  ;;  %v1255_v47 = vld [vmem:[%s5126_s7 + $0x1d0] sm:$0xff]  ;;  %v1202_v45 = vld [vmem:[%s5126_s7 + $0x28] sm:$0xff] }
 0x160   :  { %3134 = vmatprep.subr.mxu1 %v1224_v56  ;;  %3171 = vmatprep.subr.mxu0 %v1255_v47  ;;  %v1239_v56 = vld [vmem:[%s5126_s7 + $0x150] sm:$0xff]  ;;  %v1217_v47 = vld [vmem:[%s5126_s7 + $0xa0] sm:$0xff] }
 0x161   :  { %3135 = vmatpush3.msra.mxu1 %v1208_v8  ;;  %3172 = vmatpush3.msra.mxu0 %v1239_v56  ;;  %v1254_v8 = vld [vmem:[%s5126_s7 + $0x1c8] sm:$0xff]  ;;  %v1201_v56 = vld [vmem:[%s5126_s7 + $0x20] sm:$0xff] }
 0x162   :  { %3136 = vmatprep.subr.mxu1 %v1223_v40  ;;  %3173 = vmatprep.subr.mxu0 %v1254_v8  ;;  %v1238_v40 = vld [vmem:[%s5126_s7 + $0x148] sm:$0xff]  ;;  %v1216_v8 = vld [vmem:[%s5126_s7 + $0x98] sm:$0xff] }
 0x163   :  { %3137 = vmatpush3.msra.mxu1 %v1207_v18  ;;  %3174 = vmatpush3.msra.mxu0 %v1238_v40  ;;  %v1253_v18 = vld [vmem:[%s5126_s7 + $0x1c0] sm:$0xff]  ;;  %v1200_v40 = vld [vmem:[%s5126_s7 + $0x18] sm:$0xff] }
 0x164   :  { %3138 = vmatprep.subr.mxu1 %v1222_v22  ;;  %3175 = vmatprep.subr.mxu0 %v1253_v18  ;;  %v1237_v22 = vld [vmem:[%s5126_s7 + $0x140] sm:$0xff]  ;;  %v1215_v18 = vld [vmem:[%s5126_s7 + $0x90] sm:$0xff] }
 0x165   :  { %3139 = vmatpush3.msra.mxu1 %v1206_v43  ;;  %3176 = vmatpush3.msra.mxu0 %v1237_v22  ;;  %v1252_v43 = vld [vmem:[%s5126_s7 + $0x1b8] sm:$0xff]  ;;  %v1199_v22 = vld [vmem:[%s5126_s7 + $0x10] sm:$0xff] }
 0x166   :  { %3140 = vmatprep.subr.mxu1 %v1221_v41  ;;  %3177 = vmatprep.subr.mxu0 %v1252_v43  ;;  %v1236_v41 = vld [vmem:[%s5126_s7 + $0x138] sm:$0xff]  ;;  %v1214_v43 = vld [vmem:[%s5126_s7 + $0x88] sm:$0xff] }
 0x167   :  { %3141 = vmatpush3.msra.mxu1 %v1205_v12  ;;  %3178 = vmatpush3.msra.mxu0 %v1236_v41  ;;  %v1251_v12 = vld [vmem:[%s5126_s7 + $0x1b0] sm:$0xff]  ;;  %v1198_v41 = vld [vmem:[%s5126_s7 + $0x8] sm:$0xff] }
 0x168   :  { %3142 = vmatprep.subr.mxu1 %v1220_v33  ;;  %3179 = vmatprep.subr.mxu0 %v1251_v12  ;;  %v1235_v33 = vld [vmem:[%s5126_s7 + $0x130] sm:$0xff]  ;;  %v1213_v12 = vld [vmem:[%s5126_s7 + $0x80] sm:$0xff] }
 0x169   :  { %3143 = vmatpush3.msra.mxu1 %v1204_v35  ;;  %v1250_v35 = vld [vmem:[%s5126_s7 + $0x1a8] sm:$0xff]  ;;  %3180 = vmatpush3.msra.mxu0 %v1235_v33  ;;  %v1197_v33 = vld [vmem:[%s5126_s7] sm:$0xff] }
 0x16a   :  { %3144 = vmatprep.subr.mxu1 %v1219_v24  ;;  %v1234_v24 = vld [vmem:[%s5126_s7 + $0x128] sm:$0xff]  ;;  %3181 = vmatprep.subr.mxu0 %v1250_v35 }
 0x16b   :  { %3145 = vmatpush3.msra.mxu1 %v1203_v48  ;;  %v1249_v48 = vld [vmem:[%s5126_s7 + $0x1a0] sm:$0xff]  ;;  %3182 = vmatpush3.msra.mxu0 %v1234_v24  ;;  %v1246_v35 = vld [vmem:[%s5126_s7 + $0x188] sm:$0xff] }
 0x16c   :  { %3146 = vmatprep.subr.mxu1 %v1218_v39  ;;  %v1233_v39 = vld [vmem:[%s5126_s7 + $0x120] sm:$0xff]  ;;  %3183 = vmatprep.subr.mxu0 %v1249_v48 }
 0x16d   :  { %3147 = vmatpush3.msra.mxu1 %v1202_v45  ;;  %v1248_v45 = vld [vmem:[%s5126_s7 + $0x198] sm:$0xff]  ;;  %3184 = vmatpush3.msra.mxu0 %v1233_v39  ;;  %v1245_v24 = vld [vmem:[%s5126_s7 + $0x180] sm:$0xff] }
 0x16e   :  { %3148 = vmatprep.subr.mxu1 %v1217_v47  ;;  %v1232_v47 = vld [vmem:[%s5126_s7 + $0x118] sm:$0xff]  ;;  %3185 = vmatprep.subr.mxu0 %v1248_v45 }
 0x16f   :  { %3149 = vmatpush3.msra.mxu1 %v1201_v56  ;;  %v1247_v56 = vld [vmem:[%s5126_s7 + $0x190] sm:$0xff]  ;;  %3186 = vmatpush3.msra.mxu0 %v1232_v47 }
 0x170   :  { %3150 = vmatprep.subr.mxu1 %v1216_v8  ;;  %3187 = vmatprep.subr.mxu0 %v1247_v56  ;;  %v1231_v8 = vld [vmem:[%s5126_s7 + $0x110] sm:$0xff]  ;;  %v1167_v56 = vld [vmem:[%s5125_s6] sm:$0xf] }
 0x171   :  { %3151 = vmatpush3.msra.mxu1 %v1200_v40  ;;  %3188 = vmatpush3.msra.mxu0 %v1231_v8  ;;  %v1230_v40 = vld [vmem:[%s5126_s7 + $0x108] sm:$0xff]  ;;  %v1184_v59 = vrot.slane %v1167_v56, %v4596_v51 }
 0x172   :  { %3152 = vmatprep.subr.mxu1 %v1215_v18  ;;  %3189 = vmatprep.subr.mxu0 %v1246_v35  ;;  %v1229_v18 = vld [vmem:[%s5126_s7 + $0x100] sm:$0xff] }
 0x173   :  { %3153 = vmatpush3.msra.mxu1 %v1199_v22  ;;  %3190 = vmatpush3.msra.mxu0 %v1230_v40 }
 0x174   :  { %3154 = vmatprep.subr.mxu1 %v1214_v43  ;;  %3191 = vmatprep.subr.mxu0 %v1245_v24  ;;  %v4592_v24 = vsub.s32 2, %v4132_v37 }
 0x175   :  { %3155 = vmatpush3.msra.mxu1 %v1198_v41  ;;  %3192 = vmatpush3.msra.mxu0 %v1229_v18 }
 0x176   :  { %3156 = vmatprep.subr.mxu1 %v1213_v12  ;;  %v4580_v12 = vsub.s32 0, %v4132_v37  ;;  %v1180_v0 = vrot.slane %v1167_v56, %v4592_v24 }
 0x177   :  { %3157 = vmatpush3.msra.mxu1 %v1197_v33  ;;  %v4586_v33 = vsub.s32 1, %v4132_v37 }
 0x178   :  { %v1172_v40 = vrot.slane %v1167_v56, %v4580_v12 }
 0x179   :  { %v1176_v49 = vrot.slane %v1167_v56, %v4586_v33 }
 0x204   :  { %v794_v48 = vpop.f32.mrf.mxu1 }
 0x206   :  { %v796_v22 = vpop.f32.mrf.mxu1 }
 0x208   :  { %v865_v39 = vpop.f32.mrf.mxu1 }
 0x20a   :  { %v867_v43 = vpop.f32.mrf.mxu1 }
 0x20c   :  { %v4573_v45 = vpop.f32.mrf.mxu1 }
 0x20e   :  { %v4575_v41 = vpop.f32.mrf.mxu1 }
 0x210   :  { %v4577_v47 = vpop.f32.mrf.mxu1 }
 0x212   :  { %v4588_v8 = vpop.f32.mrf.mxu1 }
 0x214   :  { %v1087_v35 = vpop.f32.mrf.mxu1 }
 0x215   :  { %v1163_v18 = vadd.f32 %v1087_v35, %v794_v48 }
 0x216   :  { %v1089_v26 = vpop.f32.mrf.mxu1 }
 0x217   :  { %v1164_v28 = vadd.f32 %v1089_v26, %v796_v22  ;;  %v1189_v53 = vadd.f32 %v1172_v40, %v1163_v18 }
 0x218   :  { %v1158_v55 = vpop.f32.mrf.mxu1 }
 0x219   :  { %v1190_v16 = vadd.f32 %v1176_v49, %v1164_v28  ;;  %v1165_v57 = vadd.f32 %v1158_v55, %v865_v39 }
 0x21a   :  { %v1160_v30 = vpop.f32.mrf.mxu1 }
 0x21b   :  { %3275 = vtanh.f32 %v1190_v16  ;;  %v1166_v32 = vadd.f32 %v1160_v30, %v867_v43  ;;  %v1191_v48 = vadd.f32 %v1180_v0, %v1165_v57  ;;  %v1408_v16 = vld [vmem:[%s5128_s9] sm:$0xff] }
 0x21c   :  { %3277 = vtanh.f32 %v1189_v53  ;;  %v1417_v28 = vrot.slane %v1408_v16, %v4159_v4 }
 0x21d   :  { %v1192_v35 = vadd.f32 %v1184_v59, %v1166_v32  ;;  %v1410_v32 = vcombine.high %v1408_v16, %v1408_v16 }
 0x21e   :  { %v1425_v30 = vcombine.high %v1417_v28, %v1417_v28 }
 0x21f   :  { %3279 = vtanh.f32 %v1192_v35  ;;  %v1424_v49 = vrot.slane %v1410_v32, %v4159_v4  ;;  %v1586_v4 = vld [vmem:[%s5129_s10] sm:$0xf] }
 0x220   :  { %3281 = vtanh.f32 %v1191_v48  ;;  %2877 = vmatprep.subr.msk.mxu1 %vm1431_vm3, %v1425_v30  ;;  %v1591_v18 = vrot.slane %v1586_v4, %v4580_v12 }
 0x221   :  { %v1426_v53 = vcombine.high %v1424_v49, %v1424_v49 }
 0x228   :  { %v3276_v37 = vpop.eup %3275 }
 0x229   :  { %v3278_v61 = vpop.eup %3277  ;;  %1332 = vmatprep.mubr.f32.mxu1 %v3276_v37  ;;  %v1595_v37 = vrot.slane %v1586_v4, %v4586_v33 }
 0x22a   :  { %1333 = vmatmul.mubr.f32.vlgmr.msra.gmra.mxu1 %v3278_v61  ;;  %v2876_v61 = vld [vmem:[%s5127_s8] ss:$0 sm:$0xff] }
 0x22b   :  { %1504 = vmatprep.mubr.f32.mxu1 %v5327_v20  ;;  %2878 = vmatpush1.msk.msra.mxu1 %vm1431_vm3, %v1417_v28  ;;  %v1599_v28 = vrot.slane %v1586_v4, %v4592_v24 }
 0x22c   :  { %v3280_v26 = vpop.eup %3279  ;;  %2880 = vmatprep.subr.msk.mxu1 %vm1431_vm3, %v1426_v53 }
 0x22d   :  { %v3282_v22 = vpop.eup %3281  ;;  %1402 = vmatprep.mubr.f32.mxu0 %v3280_v26 }
 0x22e   :  { %1403 = vmatmul.mubr.f32.vlgmr.msra.gmra.mxu0 %v3282_v22 }
 0x2ea   :  { %v3158_v55 = vpop.f32.mrf.mxu1 }
 0x2ec   :  { %v3159_v57 = vpop.f32.mrf.mxu1 }
 0x2ed   :  { %v3160_v59 = vadd.f32 %v3159_v57, %v3158_v55  ;;  %v1603_v57 = vrot.slane %v1586_v4, %v4596_v51 }
 0x2ee   :  { %v3193_v0 = vpop.f32.mrf.mxu0 }
 0x2ef   :  { %v1335_v43 = vadd.f32 %v3160_v59, %v2876_v61 }
 0x2f0   :  { %v3194_v39 = vpop.f32.mrf.mxu0 }
 0x2f1   :  { %v3195_v56 = vadd.f32 %v3194_v39, %v3193_v0 }
 0x2f3   :  { %v4612_v40 = vadd.f32 %v3195_v56, %v1335_v43 }
 0x2f5   :  { %2879 = vmatmul.mubr.msk.f32.vlgmr.msra.gmra.mxu1 %vm1427_vm4, %v4612_v40 }
 0x2f6   :  { %2881 = vmatpush1.msk.msra.mxu1 %vm1431_vm3, %v1424_v49  ;;  %1575 = vmatprep.mubr.f32.mxu1 %v5327_v20 }
 0x2f9   :  { %2882 = vmatmul.mubr.msk.f32.vlgmr.msra.gmra.mxu1 %vm1427_vm4, %v4612_v40 }
 0x3b5   :  { %v1506_v48 = vpop.f32.mrf.mxu1 }
 0x3b6   :  { %v1582_v35 = vadd.f32 %v1506_v48, %v4573_v45 }
 0x3b7   :  { %v1508_v26 = vpop.f32.mrf.mxu1 }
 0x3b8   :  { %v1608_v22 = vadd.f32 %v1591_v18, %v1582_v35  ;;  %v1583_v16 = vadd.f32 %v1508_v26, %v4575_v41 }
 0x3b9   :  { %v1577_v30 = vpop.f32.mrf.mxu1 }
 0x3ba   :  { %v1616_v32 = vmin.f32 %v1608_v22, 0.0  ;;  %v1609_v49 = vadd.f32 %v1595_v37, %v1583_v16  ;;  %v1584_v53 = vadd.f32 %v1577_v30, %v4577_v47  ;;  %vm1612_vm5 = vcmp.gt.f32.partialorder %v1608_v22, 0.0 }
 0x3bb   :  { %v1579_v55 = vpop.f32.mrf.mxu1 }
 0x3bc   :  { %v1620_v59 = vmul.f32 1.442695, %v1616_v32  ;;  %v1617_v61 = vmin.f32 %v1609_v49, 0.0  ;;  %v1610_v0 = vadd.f32 %v1599_v28, %v1584_v53  ;;  %v1585_v45 = vadd.f32 %v1579_v55, %v4588_v8 }
 0x3bd   :  { %vm1613_vm6 = vcmp.gt.f32.partialorder %v1609_v49, 0.0 }
 0x3be   :  { %3283 = vpow2.f32 %v1620_v59  ;;  %v1622_v39 = vmul.f32 1.442695, %v1617_v61  ;;  %v1618_v43 = vmin.f32 %v1610_v0, 0.0  ;;  %v1611_v56 = vadd.f32 %v1603_v57, %v1585_v45 }
 0x3bf   :  { %vm1614_vm7 = vcmp.gt.f32.partialorder %v1610_v0, 0.0  ;;  %v2916_v57 = vcombine.high %v3530_v29, %v3540_v31  ;;  %v2980_v59 = vcombine.high %v3850_v60, %v3860_v14 }
 0x3c0   :  { %3285 = vpow2.f32 %v1622_v39  ;;  %v1624_v41 = vmul.f32 1.442695, %v1618_v43  ;;  %v1619_v18 = vmin.f32 %v1611_v56, 0.0  ;;  %vm1615_vm8 = vcmp.gt.f32.partialorder %v1611_v56, 0.0 }
 0x3c2   :  { %3287 = vpow2.f32 %v1624_v41  ;;  %v1626_v48 = vmul.f32 1.442695, %v1619_v18 }
 0x3c4   :  { %3289 = vpow2.f32 %v1626_v48 }
 0x3cb   :  { %v3284_v35 = vpop.eup %3283 }
 0x3cc   :  { %v2883_v47 = vadd.f32 -1.0, %v3284_v35 }
 0x3cd   :  { %v3286_v37 = vpop.eup %3285 }
 0x3ce   :  { %v4629_v4 = vsel %vm1612_vm5, %v1608_v22, %v2883_v47  ;;  %v2884_v26 = vadd.f32 -1.0, %v3286_v37  ;;  %v2915_v22 = vcombine.low %v3530_v29, %v3540_v31 }
 0x3cf   :  { %v3288_v16 = vpop.eup %3287 }
 0x3d0   :  { %v1633_v8 = vsel %vm1613_vm6, %v1609_v49, %v2884_v26  ;;  %v2885_v28 = vadd.f32 -1.0, %v3288_v16  ;;  %v2979_v49 = vcombine.low %v3850_v60, %v3860_v14 }
 0x3d1   :  { %v3290_v30 = vpop.eup %3289 }
 0x3d2   :  { %v4631_v32 = vsel %vm1614_vm7, %v1610_v0, %v2885_v28  ;;  %v2886_v53 = vadd.f32 -1.0, %v3290_v30 }
 0x3d4   :  { %v1635_v55 = vsel %vm1615_vm8, %v1611_v56, %v2886_v53 }
 0x3d5   :  { %3299 = dma.done.wait [#allocation3], 16384 }
 0x3d6   :  { %3300 = vsyncadd [#allocation3], 4294950912  ;;  %v2912_v61 = vcombine.high %v3510_v25, %v3520_v27  ;;  %v2976_v0 = vcombine.high %v3830_v52, %v3840_v10  ;;  %2833 = vst [vmem:[%s5134_s15] sm:$0x3] %v5327_v20  ;;  %2434 = vmatprep.subr.bf16.mxu0 %v2916_v57  ;;  %2475 = vmatprep.subr.bf16.mxu1 %v2980_v59  ;;  %v5334_v48 = vld [vmem:[#allocation94_spill] sm:$0xff]  ;;  %v5336_v26 = vld [vmem:[#allocation43_spill] sm:$0xff]  ;;  %vm2834_vm13 = vcmask 9216  }
 0x3d7   :  { %2435 = vmatpush1.bf16.msra.mxu0 %v2915_v22  ;;  %2476 = vmatpush1.bf16.msra.mxu1 %v2979_v49  ;;  %v2911_v14 = vcombine.low %v3510_v25, %v3520_v27  ;;  %v2975_v29 = vcombine.low %v3830_v52, %v3840_v10  ;;  %v2908_v31 = vcombine.high %v3490_v21, %v3500_v23  ;;  %v5338_v28 = vld [vmem:[#allocation90_spill] sm:$0xff]  ;;  %v5339_v57 = vld [vmem:[#allocation41_spill] sm:$0xff]  ;;  %v5340_v59 = vld [vmem:[#allocation39_spill] sm:$0xff]  ;;  %s3303_s2 = smov 2   ;;  %vm2840_vm14 = vcmask 17424  }
 0x3d8   :  { %2436 = vmatprep.subr.bf16.mxu0 %v2912_v61  ;;  %2477 = vmatprep.subr.bf16.mxu1 %v2976_v0  ;;  %v2972_v60 = vcombine.high %v3810_v44, %v3820_v6  ;;  %v2907_v20 = vcombine.low %v3490_v21, %v3500_v23  ;;  %v2971_v45 = vcombine.low %v3810_v44, %v3820_v6  ;;  %v5341_v49 = vld [vmem:[#allocation88_spill] sm:$0xff]  ;;  %v5342_v61 = vld [vmem:[#allocation86_spill] sm:$0xff] }
 0x3d9   :  { %v2904_v10 = vcombine.high %v3470_v17, %v3480_v19  ;;  %v2968_v25 = vcombine.high %v3790_v36, %v3800_v2  ;;  %v2903_v27 = vcombine.low %v3470_v17, %v3480_v19  ;;  %v2967_v52 = vcombine.low %v3790_v36, %v3800_v2  ;;  %2835 = vst.msk [vmem:[%s5134_s15] sm:$0x3] %vm2834_vm13, %v4612_v40 }
 0x3da   :  { %v2900_v6 = vcombine.high %v3450_v13, %v3460_v15  ;;  %v2964_v21 = vcombine.high %v3770_v58, %v3780_v62  ;;  %v2899_v23 = vcombine.low %v3450_v13, %v3460_v15  ;;  %v2963_v44 = vcombine.low %v3770_v58, %v3780_v62 }
 0x3db   :  { %2437 = vmatpush1.bf16.msra.mxu0 %v2911_v14  ;;  %2478 = vmatpush1.bf16.msra.mxu1 %v2975_v29  ;;  %v2896_v2 = vcombine.high %v3430_v9, %v3440_v11  ;;  %v2960_v17 = vcombine.high %v3750_v50, %v3760_v54  ;;  %v4681_v19 = vpack.c.bf16 %v1633_v8, %v1633_v8  ;;  %v5337_v8 = vld [vmem:[#allocation92_spill] sm:$0xff] }
 0x3dc   :  { %2438 = vmatprep.subr.bf16.mxu0 %v2908_v31  ;;  %2479 = vmatprep.subr.bf16.mxu1 %v2972_v60  ;;  %v4683_v36 = vpack.c.bf16 %v1635_v55, %v1635_v55  ;;  %v2895_v13 = vcombine.low %v3430_v9, %v3440_v11  ;;  %v2959_v15 = vcombine.low %v3750_v50, %v3760_v54  ;;  %v5343_v31 = vld [vmem:[#allocation37_spill] sm:$0xff]  ;;  %v5344_v60 = vld [vmem:[#allocation35_spill] sm:$0xff] }
 0x3dd   :  { %v2892_v58 = vcombine.high %v3410_v5, %v3420_v7  ;;  %v2956_v62 = vcombine.high %v3730_v42, %v3740_v46  ;;  %2466 = vmatprep.mubr.bf16.mxu0 %v4681_v19  ;;  %v2891_v9 = vcombine.low %v3410_v5, %v3420_v7  ;;  %v2955_v11 = vcombine.low %v3730_v42, %v3740_v46  ;;  %v5328_v5 = vld [vmem:[#allocation51_spill] sm:$0xff]  ;;  %v5329_v42 = vld [vmem:[#allocation100_spill] sm:$0xff]  ;;  %v5330_v46 = vld [vmem:[#allocation98_spill] sm:$0xff] }
 0x3de   :  { %2507 = vmatprep.mubr.bf16.mxu1 %v4683_v36  ;;  %v2888_v50 = vcombine.high %v3390_v1, %v3400_v3  ;;  %v2952_v54 = vcombine.high %v3710_v34, %v3720_v38  ;;  %v2887_v39 = vcombine.low %v3390_v1, %v3400_v3  ;;  %v2951_v43 = vcombine.low %v3710_v34, %v3720_v38  ;;  %v5331_v1 = vld [vmem:[#allocation49_spill] sm:$0xff]  ;;  %v5332_v3 = vld [vmem:[#allocation47_spill] sm:$0xff]  ;;  %v5333_v38 = vld [vmem:[#allocation96_spill] sm:$0xff] }
 0x3df   :  { %2439 = vmatpush1.bf16.msra.mxu0 %v2907_v20  ;;  %2480 = vmatpush1.bf16.msra.mxu1 %v2971_v45  ;;  %v2948_v7 = vcombine.high %v5328_v5, %v3700_v63  ;;  %v3012_v56 = vcombine.high %v5330_v46, %v5329_v42  ;;  %v2947_v41 = vcombine.low %v5328_v5, %v3700_v63  ;;  %v5335_v63 = vld [vmem:[#allocation45_spill] sm:$0xff]  ;;  %v5345_v45 = vld [vmem:[#allocation84_spill] sm:$0xff] }
 0x3e0   :  { %2440 = vmatprep.subr.bf16.mxu0 %v2904_v10  ;;  %2481 = vmatprep.subr.bf16.mxu1 %v2968_v25  ;;  %v3011_v18 = vcombine.low %v5330_v46, %v5329_v42  ;;  %v2944_v34 = vcombine.high %v5332_v3, %v5331_v1  ;;  %v3008_v35 = vcombine.high %v5334_v48, %v5333_v38  ;;  %v5346_v10 = vld [vmem:[#allocation82_spill] sm:$0xff]  ;;  %v5355_v5 = vld [vmem:[#allocation25_spill] sm:$0xff]  ;;  %v5357_v46 = vld [vmem:[#allocation72_spill] sm:$0xff] }
 0x3e1   :  { %v2943_v47 = vcombine.low %v5332_v3, %v5331_v1  ;;  %v3007_v37 = vcombine.low %v5334_v48, %v5333_v38  ;;  %v2940_v16 = vcombine.high %v5336_v26, %v5335_v63  ;;  %v3004_v30 = vcombine.high %v5338_v28, %v5337_v8  ;;  %v5359_v3 = vld [vmem:[#allocation22_spill] sm:$0xff]  ;;  %v5361_v48 = vld [vmem:[#allocation69_spill] sm:$0xff] }
 0x3e2   :  { %v2939_v53 = vcombine.low %v5336_v26, %v5335_v63  ;;  %v3003_v55 = vcombine.low %v5338_v28, %v5337_v8  ;;  %v2936_v22 = vcombine.high %v5340_v59, %v5339_v57  ;;  %v3000_v0 = vcombine.high %v5342_v61, %v5341_v49  ;;  %v5363_v8 = vld [vmem:[#allocation20_spill] sm:$0xff]  ;;  %v5364_v28 = vld [vmem:[#allocation19_spill] sm:$0xff] }
 0x3e3   :  { %2441 = vmatpush1.bf16.msra.mxu0 %v2903_v27  ;;  %2482 = vmatpush1.bf16.msra.mxu1 %v2967_v52  ;;  %v2935_v14 = vcombine.low %v5340_v59, %v5339_v57  ;;  %v2999_v29 = vcombine.low %v5342_v61, %v5341_v49  ;;  %v2932_v20 = vcombine.high %v5344_v60, %v5343_v31  ;;  %v5367_v59 = vld [vmem:[#allocation18_spill] sm:$0xff]  ;;  %v5369_v61 = vld [vmem:[#allocation65_spill] sm:$0xff] }
 0x3e4   :  { %2442 = vmatprep.subr.bf16.mxu0 %v2900_v6  ;;  %2483 = vmatprep.subr.bf16.mxu1 %v2964_v21  ;;  %v2996_v25 = vcombine.high %v5346_v10, %v5345_v45  ;;  %v2931_v27 = vcombine.low %v5344_v60, %v5343_v31  ;;  %v2995_v52 = vcombine.low %v5346_v10, %v5345_v45  ;;  %v5347_v6 = vld [vmem:[#allocation33_spill] sm:$0xff]  ;;  %v5348_v21 = vld [vmem:[#allocation31_spill] sm:$0xff]  ;;  %v5371_v60 = vld [vmem:[#allocation16_spill] sm:$0xff] }
 0x3e5   :  { %v4781_v63 = vpack.c.bf16 %v4631_v32, %v4631_v32  ;;  %v2913_v32 = vcombine.low %v5364_v28, %v5363_v8  ;;  %v5373_v10 = vld [vmem:[#allocation63_spill] sm:$0xff] }
 0x3e7   :  { %2443 = vmatpush1.bf16.msra.mxu0 %v2899_v23  ;;  %2484 = vmatpush1.bf16.msra.mxu1 %v2963_v44  ;;  %v2928_v23 = vcombine.high %v5348_v21, %v5347_v6  ;;  %v5349_v44 = vld [vmem:[#allocation80_spill] sm:$0xff] }
 0x3e8   :  { %2444 = vmatprep.subr.bf16.mxu0 %v2896_v2  ;;  %2485 = vmatprep.subr.bf16.mxu1 %v2960_v17  ;;  %v5350_v2 = vld [vmem:[#allocation78_spill] sm:$0xff] }
 0x3e9   :  { %v2992_v17 = vcombine.high %v5350_v2, %v5349_v44 }
 0x3eb   :  { %2445 = vmatpush1.bf16.msra.mxu0 %v2895_v13  ;;  %2486 = vmatpush1.bf16.msra.mxu1 %v2959_v15  ;;  %v2927_v13 = vcombine.low %v5348_v21, %v5347_v6  ;;  %v2991_v15 = vcombine.low %v5350_v2, %v5349_v44  ;;  %v5376_v6 = vld [vmem:[#allocation13_spill] sm:$0xff]  ;;  %v5378_v44 = vld [vmem:[#allocation60_spill] sm:$0xff] }
 0x3ec   :  { %2446 = vmatprep.subr.bf16.mxu0 %v2892_v58  ;;  %2487 = vmatprep.subr.bf16.mxu1 %v2956_v62  ;;  %v5351_v58 = vld [vmem:[#allocation29_spill] sm:$0xff]  ;;  %v5352_v62 = vld [vmem:[#allocation27_spill] sm:$0xff] }
 0x3ef   :  { %2447 = vmatpush1.bf16.msra.mxu0 %v2891_v9  ;;  %2488 = vmatpush1.bf16.msra.mxu1 %v2955_v11  ;;  %v2924_v9 = vcombine.high %v5352_v62, %v5351_v58  ;;  %v5353_v11 = vld [vmem:[#allocation76_spill] sm:$0xff] }
 0x3f0   :  { %2448 = vmatprep.subr.bf16.mxu0 %v2888_v50  ;;  %2489 = vmatprep.subr.bf16.mxu1 %v2952_v54  ;;  %v5354_v50 = vld [vmem:[#allocation74_spill] sm:$0xff] }
 0x3f1   :  { %v2988_v54 = vcombine.high %v5354_v50, %v5353_v11 }
 0x3f3   :  { %2449 = vmatpush1.bf16.msra.mxu0 %v2887_v39  ;;  %2490 = vmatpush1.bf16.msra.mxu1 %v2951_v43  ;;  %v2923_v39 = vcombine.low %v5352_v62, %v5351_v58  ;;  %v2987_v43 = vcombine.low %v5354_v50, %v5353_v11  ;;  %v5380_v58 = vld [vmem:[#allocation11_spill] sm:$0xff]  ;;  %v5382_v11 = vld [vmem:[#allocation58_spill] sm:$0xff] }
 0x3f4   :  { %2450 = vmatprep.subr.bf16.mxu0 %v2948_v7  ;;  %2491 = vmatprep.subr.bf16.mxu1 %v3012_v56  ;;  %v5356_v7 = vld [vmem:[#allocation23_spill] sm:$0xff]  ;;  %v5358_v56 = vld [vmem:[#allocation70_spill] sm:$0xff] }
 0x3f5   :  { %v2920_v42 = vcombine.high %v5356_v7, %v5355_v5  ;;  %v2983_v1 = vcombine.low %v5358_v56, %v5357_v46 }
 0x3f7   :  { %2451 = vmatpush2.bf16.msra.mxu0 %v2947_v41  ;;  %2492 = vmatpush2.bf16.msra.mxu1 %v3011_v18  ;;  %v2984_v41 = vcombine.high %v5358_v56, %v5357_v46  ;;  %v2919_v18 = vcombine.low %v5356_v7, %v5355_v5  ;;  %v5384_v5 = vld [vmem:[#allocation9_spill] sm:$0xff]  ;;  %v5386_v46 = vld [vmem:[#allocation56_spill] sm:$0xff] }
 0x3f8   :  { %2452 = vmatprep.subr.bf16.mxu0 %v2944_v34  ;;  %2493 = vmatprep.subr.bf16.mxu1 %v3008_v35  ;;  %v5360_v34 = vld [vmem:[#allocation21_spill] sm:$0xff]  ;;  %v5362_v35 = vld [vmem:[#allocation68_spill] sm:$0xff] }
 0x3f9   :  { %v2918_v38 = vcombine.high %v5360_v34, %v5359_v3  ;;  %v2917_v26 = vcombine.low %v5360_v34, %v5359_v3  ;;  %v5388_v3 = vld [vmem:[#allocation7_spill] sm:$0xff] }
 0x3fb   :  { %2453 = vmatpush2.bf16.msra.mxu0 %v2943_v47  ;;  %2494 = vmatpush2.bf16.msra.mxu1 %v3007_v37  ;;  %v2982_v47 = vcombine.high %v5362_v35, %v5361_v48  ;;  %v4777_v37 = vpack.c.bf16 %v4629_v4, %v4629_v4  ;;  %v5366_v4 = vld [vmem:[#allocation66_spill] sm:$0xff] }
 0x3fc   :  { %2454 = vmatprep.subr.bf16.mxu0 %v2940_v16  ;;  %2495 = vmatprep.subr.bf16.mxu1 %v3004_v30  ;;  %v2981_v16 = vcombine.low %v5362_v35, %v5361_v48  ;;  %v2914_v30 = vcombine.high %v5364_v28, %v5363_v8  ;;  %v5390_v48 = vld [vmem:[#allocation54_spill] sm:$0xff]  ;;  %v5392_v8 = vld [vmem:[#allocation52_spill] sm:$0xff] }
 0x3ff   :  { %2455 = vmatpush2.bf16.msra.mxu0 %v2939_v53  ;;  %2496 = vmatpush2.bf16.msra.mxu1 %v3003_v55  ;;  %v5365_v53 = vld [vmem:[#allocation67_spill] sm:$0xff] }
 0x400   :  { %2456 = vmatprep.subr.bf16.mxu0 %v2936_v22  ;;  %2497 = vmatprep.subr.bf16.mxu1 %v3000_v0  ;;  %v2978_v55 = vcombine.high %v5366_v4, %v5365_v53  ;;  %v2977_v57 = vcombine.low %v5366_v4, %v5365_v53  ;;  %v5368_v22 = vld [vmem:[#allocation17_spill] sm:$0xff]  ;;  %v5370_v0 = vld [vmem:[#allocation64_spill] sm:$0xff]  ;;  %v5394_v53 = vld [vmem:[#allocation99_spill] sm:$0xff] }
 0x401   :  { %v2910_v49 = vcombine.high %v5368_v22, %v5367_v59  ;;  %v2973_v31 = vcombine.low %v5370_v0, %v5369_v61 }
 0x403   :  { %2457 = vmatpush2.bf16.msra.mxu0 %v2935_v14  ;;  %2498 = vmatpush2.bf16.msra.mxu1 %v2999_v29  ;;  %v2974_v14 = vcombine.high %v5370_v0, %v5369_v61  ;;  %v2909_v29 = vcombine.low %v5368_v22, %v5367_v59  ;;  %v5396_v59 = vld [vmem:[#allocation48_spill] sm:$0xff]  ;;  %v5398_v61 = vld [vmem:[#allocation95_spill] sm:$0xff] }
 0x404   :  { %2458 = vmatprep.subr.bf16.mxu0 %v2932_v20  ;;  %2499 = vmatprep.subr.bf16.mxu1 %v2996_v25  ;;  %v5372_v20 = vld [vmem:[#allocation15_spill] sm:$0xff]  ;;  %v5374_v25 = vld [vmem:[#allocation62_spill] sm:$0xff] }
 0x405   :  { %v2906_v45 = vcombine.high %v5372_v20, %v5371_v60 }
 0x407   :  { %2459 = vmatpush2.bf16.msra.mxu0 %v2931_v27  ;;  %2500 = vmatpush2.bf16.msra.mxu1 %v2995_v52  ;;  %v2970_v27 = vcombine.high %v5374_v25, %v5373_v10  ;;  %v5375_v52 = vld [vmem:[#allocation14_spill] sm:$0xff] }
 0x408   :  { %2460 = vmatprep.subr.bf16.mxu0 %v2928_v23  ;;  %2501 = vmatprep.subr.bf16.mxu1 %v2992_v17  ;;  %v2902_v21 = vcombine.high %v5376_v6, %v5375_v52  ;;  %v5377_v23 = vld [vmem:[#allocation61_spill] sm:$0xff]  ;;  %v2901_v17 = vcombine.low %v5376_v6, %v5375_v52  ;;  %v5404_v52 = vld [vmem:[#allocation40_spill] sm:$0xff] }
 0x409   :  { %v2966_v2 = vcombine.high %v5378_v44, %v5377_v23 }
 0x40b   :  { %2461 = vmatpush2.bf16.msra.mxu0 %v2927_v13  ;;  %2502 = vmatpush2.bf16.msra.mxu1 %v2991_v15  ;;  %v2965_v13 = vcombine.low %v5378_v44, %v5377_v23  ;;  %v5379_v15 = vld [vmem:[#allocation12_spill] sm:$0xff]  ;;  %v5406_v23 = vld [vmem:[#allocation87_spill] sm:$0xff] }
 0x40c   :  { %2462 = vmatprep.subr.bf16.mxu0 %v2924_v9  ;;  %2503 = vmatprep.subr.bf16.mxu1 %v2988_v54  ;;  %v2898_v62 = vcombine.high %v5380_v58, %v5379_v15  ;;  %v5381_v9 = vld [vmem:[#allocation59_spill] sm:$0xff]  ;;  %v2897_v54 = vcombine.low %v5380_v58, %v5379_v15  ;;  %v5408_v15 = vld [vmem:[#allocation36_spill] sm:$0xff] }
 0x40d   :  { %v2962_v50 = vcombine.high %v5382_v11, %v5381_v9 }
 0x40f   :  { %2463 = vmatpush2.bf16.msra.mxu0 %v2923_v39  ;;  %2504 = vmatpush2.bf16.msra.mxu1 %v2987_v43  ;;  %v2961_v39 = vcombine.low %v5382_v11, %v5381_v9  ;;  %v5383_v43 = vld [vmem:[#allocation10_spill] sm:$0xff]  ;;  %v5410_v9 = vld [vmem:[#allocation83_spill] sm:$0xff] }
 0x410   :  { %2464 = vmatprep.subr.bf16.mxu0 %v2920_v42  ;;  %2505 = vmatprep.subr.bf16.mxu1 %v2984_v41  ;;  %v2894_v7 = vcombine.high %v5384_v5, %v5383_v43  ;;  %v5385_v42 = vld [vmem:[#allocation57_spill] sm:$0xff]  ;;  %v2893_v41 = vcombine.low %v5384_v5, %v5383_v43  ;;  %v5412_v43 = vld [vmem:[#allocation32_spill] sm:$0xff] }
 0x411   :  { %v2958_v56 = vcombine.high %v5386_v46, %v5385_v42 }
 0x413   :  { %2465 = vmatpush2.bf16.msra.mxu0 %v2919_v18  ;;  %2506 = vmatpush2.bf16.msra.mxu1 %v2983_v1  ;;  %v2957_v18 = vcombine.low %v5386_v46, %v5385_v42  ;;  %v5387_v1 = vld [vmem:[#allocation8_spill] sm:$0xff]  ;;  %v5414_v42 = vld [vmem:[#allocation79_spill] sm:$0xff] }
 0x414   :  { %2516 = vmatprep.subr.bf16.mxu0 %v2918_v38  ;;  %2557 = vmatprep.subr.bf16.mxu1 %v2982_v47  ;;  %v2890_v34 = vcombine.high %v5388_v3, %v5387_v1  ;;  %v5389_v38 = vld [vmem:[#allocation55_spill] sm:$0xff]  ;;  %v2889_v47 = vcombine.low %v5388_v3, %v5387_v1  ;;  %v5416_v1 = vld [vmem:[#allocation28_spill] sm:$0xff] }
 0x415   :  { %v2954_v35 = vcombine.high %v5390_v48, %v5389_v38 }
 0x416   :  { %2467 = vmatmul.mubr.bf16.vlgmr.msra.gmra.mxu0 %v4777_v37  ;;  %2508 = vmatmul.mubr.bf16.vlgmr.msra.gmra.mxu1 %v4781_v63 }
 0x417   :  { %2517 = vmatpush1.bf16.msra.mxu0 %v2917_v26  ;;  %2558 = vmatpush1.bf16.msra.mxu1 %v2981_v16  ;;  %v2953_v26 = vcombine.low %v5390_v48, %v5389_v38  ;;  %v5391_v16 = vld [vmem:[#allocation53_spill] sm:$0xff]  ;;  %v5418_v38 = vld [vmem:[#allocation75_spill] sm:$0xff] }
 0x418   :  { %2518 = vmatprep.subr.bf16.mxu0 %v2914_v30  ;;  %2559 = vmatprep.subr.bf16.mxu1 %v2978_v55  ;;  %v2950_v28 = vcombine.high %v5392_v8, %v5391_v16  ;;  %v5393_v30 = vld [vmem:[#allocation101_spill] sm:$0xff]  ;;  %v2949_v55 = vcombine.low %v5392_v8, %v5391_v16  ;;  %v5420_v16 = vld [vmem:[#allocation24_spill] sm:$0xff] }
 0x419   :  { %2548 = vmatprep.mubr.bf16.mxu0 %v4681_v19  ;;  %2589 = vmatprep.mubr.bf16.mxu1 %v4683_v36  ;;  %v2905_v19 = vcombine.low %v5372_v20, %v5371_v60  ;;  %v2969_v36 = vcombine.low %v5374_v25, %v5373_v10  ;;  %v3014_v4 = vcombine.high %v5394_v53, %v5393_v30  ;;  %v5400_v60 = vld [vmem:[#allocation44_spill] sm:$0xff]  ;;  %v5402_v10 = vld [vmem:[#allocation91_spill] sm:$0xff] }
 0x41b   :  { %2519 = vmatpush1.bf16.msra.mxu0 %v2913_v32  ;;  %2560 = vmatpush1.bf16.msra.mxu1 %v2977_v57  ;;  %v3013_v32 = vcombine.low %v5394_v53, %v5393_v30  ;;  %v5395_v57 = vld [vmem:[#allocation50_spill] sm:$0xff]  ;;  %v5422_v30 = vld [vmem:[#allocation71_spill] sm:$0xff] }
 0x41c   :  { %2520 = vmatprep.subr.bf16.mxu0 %v2910_v49  ;;  %2561 = vmatprep.subr.bf16.mxu1 %v2974_v14  ;;  %v2946_v22 = vcombine.high %v5396_v59, %v5395_v57  ;;  %v5397_v49 = vld [vmem:[#allocation97_spill] sm:$0xff]  ;;  %v2945_v14 = vcombine.low %v5396_v59, %v5395_v57 }
 0x41d   :  { %v3010_v0 = vcombine.high %v5398_v61, %v5397_v49  ;;  %v2637_v57 = vld [vmem:[%s5132_s13 + $0x78] sm:$0xff]  ;;  %v2652_v59 = vld [vmem:[%s5132_s13 + $0xf0] sm:$0xff] }
 0x41f   :  { %2521 = vmatpush1.bf16.msra.mxu0 %v2909_v29  ;;  %2562 = vmatpush1.bf16.msra.mxu1 %v2973_v31  ;;  %v3009_v29 = vcombine.low %v5398_v61, %v5397_v49  ;;  %v5399_v31 = vld [vmem:[#allocation46_spill] sm:$0xff]  ;;  %v2651_v49 = vld [vmem:[%s5132_s13 + $0xe8] sm:$0xff] }
 0x420   :  { %2522 = vmatprep.subr.bf16.mxu0 %v2906_v45  ;;  %2563 = vmatprep.subr.bf16.mxu1 %v2970_v27  ;;  %v2942_v20 = vcombine.high %v5400_v60, %v5399_v31  ;;  %v5401_v45 = vld [vmem:[#allocation93_spill] sm:$0xff]  ;;  %v2941_v27 = vcombine.low %v5400_v60, %v5399_v31  ;;  %v2635_v61 = vld [vmem:[%s5132_s13 + $0x68] sm:$0xff] }
 0x421   :  { %v3006_v25 = vcombine.high %v5402_v10, %v5401_v45  ;;  %v2632_v31 = vld [vmem:[%s5132_s13 + $0x50] sm:$0xff]  ;;  %v2647_v60 = vld [vmem:[%s5132_s13 + $0xc8] sm:$0xff] }
 0x423   :  { %2523 = vmatpush1.bf16.msra.mxu0 %v2905_v19  ;;  %2564 = vmatpush1.bf16.msra.mxu1 %v2969_v36  ;;  %v3005_v19 = vcombine.low %v5402_v10, %v5401_v45  ;;  %v5403_v36 = vld [vmem:[#allocation42_spill] sm:$0xff] }
 0x424   :  { %2524 = vmatprep.subr.bf16.mxu0 %v2902_v21  ;;  %2565 = vmatprep.subr.bf16.mxu1 %v2966_v2  ;;  %v2938_v6 = vcombine.high %v5404_v52, %v5403_v36  ;;  %v5405_v21 = vld [vmem:[#allocation89_spill] sm:$0xff]  ;;  %v2937_v2 = vcombine.low %v5404_v52, %v5403_v36  ;;  %v2646_v45 = vld [vmem:[%s5132_s13 + $0xc0] sm:$0xff]  ;;  %v2643_v52 = vld [vmem:[%s5132_s13 + $0xa8] sm:$0xff] }
 0x425   :  { %v3002_v44 = vcombine.high %v5406_v23, %v5405_v21  ;;  %v2630_v10 = vld [vmem:[%s5132_s13 + $0x40] sm:$0xff]  ;;  %v2628_v36 = vld [vmem:[%s5132_s13 + $0x30] sm:$0xff] }
 0x427   :  { %2525 = vmatpush1.bf16.msra.mxu0 %v2901_v17  ;;  %2566 = vmatpush1.bf16.msra.mxu1 %v2965_v13  ;;  %v3001_v17 = vcombine.low %v5406_v23, %v5405_v21  ;;  %v5407_v13 = vld [vmem:[#allocation38_spill] sm:$0xff] }
 0x428   :  { %2526 = vmatprep.subr.bf16.mxu0 %v2898_v62  ;;  %2567 = vmatprep.subr.bf16.mxu1 %v2962_v50  ;;  %v2934_v58 = vcombine.high %v5408_v15, %v5407_v13  ;;  %v5409_v62 = vld [vmem:[#allocation85_spill] sm:$0xff]  ;;  %v2933_v50 = vcombine.low %v5408_v15, %v5407_v13  ;;  %v2642_v21 = vld [vmem:[%s5132_s13 + $0xa0] sm:$0xff]  ;;  %v2639_v15 = vld [vmem:[%s5132_s13 + $0x88] sm:$0xff] }
 0x429   :  { %v2998_v11 = vcombine.high %v5410_v9, %v5409_v62  ;;  %v2626_v23 = vld [vmem:[%s5132_s13 + $0x20] sm:$0xff]  ;;  %v2624_v13 = vld [vmem:[%s5132_s13 + $0x10] sm:$0xff] }
 0x42b   :  { %2527 = vmatpush1.bf16.msra.mxu0 %v2897_v54  ;;  %2568 = vmatpush1.bf16.msra.mxu1 %v2961_v39  ;;  %v2997_v54 = vcombine.low %v5410_v9, %v5409_v62  ;;  %v5411_v39 = vld [vmem:[#allocation34_spill] sm:$0xff] }
 0x42c   :  { %2528 = vmatprep.subr.bf16.mxu0 %v2894_v7  ;;  %2569 = vmatprep.subr.bf16.mxu1 %v2958_v56  ;;  %v2930_v5 = vcombine.high %v5412_v43, %v5411_v39  ;;  %v5413_v7 = vld [vmem:[#allocation81_spill] sm:$0xff]  ;;  %v2929_v56 = vcombine.low %v5412_v43, %v5411_v39  ;;  %v2638_v62 = vld [vmem:[%s5132_s13 + $0x80] sm:$0xff]  ;;  %v2683_v43 = vld [vmem:[%s5132_s13 + $0x1e8] sm:$0xff] }
 0x42d   :  { %v2994_v46 = vcombine.high %v5414_v42, %v5413_v7  ;;  %v2622_v9 = vld [vmem:[%s5132_s13] sm:$0xff]  ;;  %v2668_v39 = vld [vmem:[%s5132_s13 + $0x170] sm:$0xff] }
 0x42f   :  { %2529 = vmatpush1.bf16.msra.mxu0 %v2893_v41  ;;  %2570 = vmatpush1.bf16.msra.mxu1 %v2957_v18  ;;  %v2993_v41 = vcombine.low %v5414_v42, %v5413_v7  ;;  %v5415_v18 = vld [vmem:[#allocation30_spill] sm:$0xff] }
 0x430   :  { %2530 = vmatprep.subr.bf16.mxu0 %v2890_v34  ;;  %2571 = vmatprep.subr.bf16.mxu1 %v2954_v35  ;;  %v2926_v3 = vcombine.high %v5416_v1, %v5415_v18  ;;  %v5417_v34 = vld [vmem:[#allocation77_spill] sm:$0xff]  ;;  %v2925_v35 = vcombine.low %v5416_v1, %v5415_v18  ;;  %v2682_v7 = vld [vmem:[%s5132_s13 + $0x1e0] sm:$0xff]  ;;  %v2679_v1 = vld [vmem:[%s5132_s13 + $0x1c8] sm:$0xff] }
 0x431   :  { %v2990_v48 = vcombine.high %v5418_v38, %v5417_v34  ;;  %v2666_v42 = vld [vmem:[%s5132_s13 + $0x160] sm:$0xff]  ;;  %v2664_v18 = vld [vmem:[%s5132_s13 + $0x150] sm:$0xff] }
 0x433   :  { %2531 = vmatpush1.bf16.msra.mxu0 %v2889_v47  ;;  %2572 = vmatpush1.bf16.msra.mxu1 %v2953_v26  ;;  %v2989_v47 = vcombine.low %v5418_v38, %v5417_v34  ;;  %v5419_v26 = vld [vmem:[#allocation26_spill] sm:$0xff] }
 0x434   :  { %2532 = vmatprep.subr.bf16.mxu0 %v2950_v28  ;;  %2573 = vmatprep.subr.bf16.mxu1 %v3014_v4  ;;  %v2922_v8 = vcombine.high %v5420_v16, %v5419_v26  ;;  %v5421_v28 = vld [vmem:[#allocation73_spill] sm:$0xff]  ;;  %v2921_v4 = vcombine.low %v5420_v16, %v5419_v26  ;;  %v2678_v34 = vld [vmem:[%s5132_s13 + $0x1c0] sm:$0xff]  ;;  %v2675_v16 = vld [vmem:[%s5132_s13 + $0x1a8] sm:$0xff] }
 0x435   :  { %v2986_v53 = vcombine.high %v5422_v30, %v5421_v28  ;;  %v2662_v38 = vld [vmem:[%s5132_s13 + $0x140] sm:$0xff]  ;;  %v2660_v26 = vld [vmem:[%s5132_s13 + $0x130] sm:$0xff] }
 0x437   :  { %2533 = vmatpush2.bf16.msra.mxu0 %v2949_v55  ;;  %2574 = vmatpush2.bf16.msra.mxu1 %v3013_v32  ;;  %v2985_v55 = vcombine.low %v5422_v30, %v5421_v28  ;;  %v2653_v32 = vld [vmem:[%s5132_s13 + $0xf8] sm:$0xff]  ;;  %v2674_v28 = vld [vmem:[%s5132_s13 + $0x1a0] sm:$0xff] }
 0x438   :  { %2534 = vmatprep.subr.bf16.mxu0 %v2946_v22  ;;  %2575 = vmatprep.subr.bf16.mxu1 %v3010_v0  ;;  %v2636_v22 = vld [vmem:[%s5132_s13 + $0x70] sm:$0xff]  ;;  %v2649_v0 = vld [vmem:[%s5132_s13 + $0xd8] sm:$0xff]  ;;  %v2658_v30 = vld [vmem:[%s5132_s13 + $0x120] sm:$0xff] }
 0x43b   :  { %2535 = vmatpush2.bf16.msra.mxu0 %v2945_v14  ;;  %2576 = vmatpush2.bf16.msra.mxu1 %v3009_v29  ;;  %v2633_v14 = vld [vmem:[%s5132_s13 + $0x58] sm:$0xff]  ;;  %v2648_v29 = vld [vmem:[%s5132_s13 + $0xd0] sm:$0xff] }
 0x43c   :  { %2536 = vmatprep.subr.bf16.mxu0 %v2942_v20  ;;  %2577 = vmatprep.subr.bf16.mxu1 %v3006_v25  ;;  %v2631_v20 = vld [vmem:[%s5132_s13 + $0x48] sm:$0xff]  ;;  %v2645_v25 = vld [vmem:[%s5132_s13 + $0xb8] sm:$0xff] }
 0x43f   :  { %2537 = vmatpush2.bf16.msra.mxu0 %v2941_v27  ;;  %2578 = vmatpush2.bf16.msra.mxu1 %v3005_v19  ;;  %v2629_v27 = vld [vmem:[%s5132_s13 + $0x38] sm:$0xff]  ;;  %v2644_v19 = vld [vmem:[%s5132_s13 + $0xb0] sm:$0xff] }
 0x440   :  { %2538 = vmatprep.subr.bf16.mxu0 %v2938_v6  ;;  %2579 = vmatprep.subr.bf16.mxu1 %v3002_v44  ;;  %v2627_v6 = vld [vmem:[%s5132_s13 + $0x28] sm:$0xff]  ;;  %v2641_v44 = vld [vmem:[%s5132_s13 + $0x98] sm:$0xff] }
 0x443   :  { %2539 = vmatpush2.bf16.msra.mxu0 %v2937_v2  ;;  %2580 = vmatpush2.bf16.msra.mxu1 %v3001_v17  ;;  %v2625_v2 = vld [vmem:[%s5132_s13 + $0x18] sm:$0xff]  ;;  %v2640_v17 = vld [vmem:[%s5132_s13 + $0x90] sm:$0xff] }
 0x444   :  { %2540 = vmatprep.subr.bf16.mxu0 %v2934_v58  ;;  %2581 = vmatprep.subr.bf16.mxu1 %v2998_v11  ;;  %v2623_v58 = vld [vmem:[%s5132_s13 + $0x8] sm:$0xff]  ;;  %v2685_v11 = vld [vmem:[%s5132_s13 + $0x1f8] sm:$0xff] }
 0x447   :  { %2541 = vmatpush2.bf16.msra.mxu0 %v2933_v50  ;;  %2582 = vmatpush2.bf16.msra.mxu1 %v2997_v54  ;;  %v2669_v50 = vld [vmem:[%s5132_s13 + $0x178] sm:$0xff]  ;;  %v2684_v54 = vld [vmem:[%s5132_s13 + $0x1f0] sm:$0xff] }
 0x448   :  { %2542 = vmatprep.subr.bf16.mxu0 %v2930_v5  ;;  %2583 = vmatprep.subr.bf16.mxu1 %v2994_v46  ;;  %v2667_v5 = vld [vmem:[%s5132_s13 + $0x168] sm:$0xff]  ;;  %v2681_v46 = vld [vmem:[%s5132_s13 + $0x1d8] sm:$0xff] }
 0x44b   :  { %2543 = vmatpush2.bf16.msra.mxu0 %v2929_v56  ;;  %2584 = vmatpush2.bf16.msra.mxu1 %v2993_v41  ;;  %v2665_v56 = vld [vmem:[%s5132_s13 + $0x158] sm:$0xff]  ;;  %v2680_v41 = vld [vmem:[%s5132_s13 + $0x1d0] sm:$0xff] }
 0x44c   :  { %2544 = vmatprep.subr.bf16.mxu0 %v2926_v3  ;;  %2585 = vmatprep.subr.bf16.mxu1 %v2990_v48  ;;  %v2663_v3 = vld [vmem:[%s5132_s13 + $0x148] sm:$0xff]  ;;  %v2677_v48 = vld [vmem:[%s5132_s13 + $0x1b8] sm:$0xff] }
 0x44f   :  { %2545 = vmatpush2.bf16.msra.mxu0 %v2925_v35  ;;  %2586 = vmatpush2.bf16.msra.mxu1 %v2989_v47  ;;  %v2661_v35 = vld [vmem:[%s5132_s13 + $0x138] sm:$0xff]  ;;  %v2676_v47 = vld [vmem:[%s5132_s13 + $0x1b0] sm:$0xff] }
 0x450   :  { %2546 = vmatprep.subr.bf16.mxu0 %v2922_v8  ;;  %2587 = vmatprep.subr.bf16.mxu1 %v2986_v53  ;;  %v2659_v8 = vld [vmem:[%s5132_s13 + $0x128] sm:$0xff]  ;;  %v2673_v53 = vld [vmem:[%s5132_s13 + $0x198] sm:$0xff] }
 0x453   :  { %2547 = vmatpush2.bf16.msra.mxu0 %v2921_v4  ;;  %2588 = vmatpush2.bf16.msra.mxu1 %v2985_v55  ;;  %v2657_v4 = vld [vmem:[%s5132_s13 + $0x118] sm:$0xff]  ;;  %v2672_v55 = vld [vmem:[%s5132_s13 + $0x190] sm:$0xff] }
 0x454   :  { %3196 = vmatprep.subr.mxu0 %v2653_v32  ;;  %3231 = vmatprep.subr.mxu1 %v2685_v11  ;;  %v2656_v32 = vld [vmem:[%s5132_s13 + $0x110] sm:$0xff] }
 0x456   :  { %2549 = vmatmul.mubr.bf16.vlgmr.msra.gmra.mxu0 %v4777_v37  ;;  %2590 = vmatmul.mubr.bf16.vlgmr.msra.gmra.mxu1 %v4781_v63  ;;  %v2650_v37 = vld [vmem:[%s5132_s13 + $0xe0] sm:$0xff] }
 0x457   :  { %3197 = vmatpush3.msra.mxu0 %v2637_v57  ;;  %v2634_v63 = vld [vmem:[%s5132_s13 + $0x60] sm:$0xff]  ;;  %3232 = vmatpush3.msra.mxu1 %v2669_v50  ;;  %v2671_v57 = vld [vmem:[%s5132_s13 + $0x188] sm:$0xff] }
 0x458   :  { %3198 = vmatprep.subr.mxu0 %v2652_v59  ;;  %3233 = vmatprep.subr.mxu1 %v2684_v54  ;;  %v2655_v59 = vld [vmem:[%s5132_s13 + $0x108] sm:$0xff] }
 0x459   :  { %3199 = vmatpush3.msra.mxu0 %v2636_v22  ;;  %3234 = vmatpush3.msra.mxu1 %v2668_v39  ;;  %v2670_v22 = vld [vmem:[%s5132_s13 + $0x180] sm:$0xff] }
 0x45a   :  { %3200 = vmatprep.subr.mxu0 %v2651_v49  ;;  %3235 = vmatprep.subr.mxu1 %v2683_v43  ;;  %v2654_v49 = vld [vmem:[%s5132_s13 + $0x100] sm:$0xff] }
 0x45b   :  { %3201 = vmatpush3.msra.mxu0 %v2635_v61  ;;  %3236 = vmatpush3.msra.mxu1 %v2667_v5  ;;  %v1772_v61 = vld [vmem:[%s5131_s12] sm:$0xf] }
 0x45c   :  { %3202 = vmatprep.subr.mxu0 %v2650_v37  ;;  %3237 = vmatprep.subr.mxu1 %v2682_v7  ;;  %v1777_v37 = vrot.slane %v1772_v61, %v4580_v12 }
 0x45d   :  { %3203 = vmatpush3.msra.mxu0 %v2634_v63  ;;  %3238 = vmatpush3.msra.mxu1 %v2666_v42  ;;  %v1781_v63 = vrot.slane %v1772_v61, %v4586_v33 }
 0x45e   :  { %3204 = vmatprep.subr.mxu0 %v2649_v0  ;;  %3239 = vmatprep.subr.mxu1 %v2681_v46 }
 0x45f   :  { %3205 = vmatpush3.msra.mxu0 %v2633_v14  ;;  %3240 = vmatpush3.msra.mxu1 %v2665_v56 }
 0x460   :  { %3206 = vmatprep.subr.mxu0 %v2648_v29  ;;  %3241 = vmatprep.subr.mxu1 %v2680_v41 }
 0x461   :  { %3207 = vmatpush3.msra.mxu0 %v2632_v31  ;;  %3242 = vmatpush3.msra.mxu1 %v2664_v18 }
 0x462   :  { %3208 = vmatprep.subr.mxu0 %v2647_v60  ;;  %3243 = vmatprep.subr.mxu1 %v2679_v1 }
 0x463   :  { %3209 = vmatpush3.msra.mxu0 %v2631_v20  ;;  %3244 = vmatpush3.msra.mxu1 %v2663_v3 }
 0x464   :  { %3210 = vmatprep.subr.mxu0 %v2646_v45  ;;  %3245 = vmatprep.subr.mxu1 %v2678_v34 }
 0x465   :  { %3211 = vmatpush3.msra.mxu0 %v2630_v10  ;;  %3246 = vmatpush3.msra.mxu1 %v2662_v38 }
 0x466   :  { %3212 = vmatprep.subr.mxu0 %v2645_v25  ;;  %3247 = vmatprep.subr.mxu1 %v2677_v48 }
 0x467   :  { %3213 = vmatpush3.msra.mxu0 %v2629_v27  ;;  %3248 = vmatpush3.msra.mxu1 %v2661_v35 }
 0x468   :  { %3214 = vmatprep.subr.mxu0 %v2644_v19  ;;  %3249 = vmatprep.subr.mxu1 %v2676_v47 }
 0x469   :  { %3215 = vmatpush3.msra.mxu0 %v2628_v36  ;;  %3250 = vmatpush3.msra.mxu1 %v2660_v26 }
 0x46a   :  { %3216 = vmatprep.subr.mxu0 %v2643_v52  ;;  %3251 = vmatprep.subr.mxu1 %v2675_v16 }
 0x46b   :  { %3217 = vmatpush3.msra.mxu0 %v2627_v6  ;;  %3252 = vmatpush3.msra.mxu1 %v2659_v8  ;;  %v3019_v8 = vld [vmem:[#allocation4] ss:$0 sm:$0xff] }
 0x46c   :  { %3218 = vmatprep.subr.mxu0 %v2642_v21  ;;  %3253 = vmatprep.subr.mxu1 %v2674_v28 }
 0x46d   :  { %3219 = vmatpush3.msra.mxu0 %v2626_v23  ;;  %3254 = vmatpush3.msra.mxu1 %v2658_v30 }
 0x46e   :  { %3220 = vmatprep.subr.mxu0 %v2641_v44  ;;  %3255 = vmatprep.subr.mxu1 %v2673_v53 }
 0x46f   :  { %3221 = vmatpush3.msra.mxu0 %v2625_v2  ;;  %3256 = vmatpush3.msra.mxu1 %v2657_v4 }
 0x470   :  { %3222 = vmatprep.subr.mxu0 %v2640_v17  ;;  %3257 = vmatprep.subr.mxu1 %v2672_v55 }
 0x471   :  { %3223 = vmatpush3.msra.mxu0 %v2624_v13  ;;  %3258 = vmatpush3.msra.mxu1 %v2656_v32 }
 0x472   :  { %3224 = vmatprep.subr.mxu0 %v2639_v15  ;;  %3259 = vmatprep.subr.mxu1 %v2671_v57  ;;  %v1785_v15 = vrot.slane %v1772_v61, %v4592_v24 }
 0x473   :  { %3225 = vmatpush3.msra.mxu0 %v2623_v58  ;;  %3260 = vmatpush3.msra.mxu1 %v2655_v59  ;;  %v1789_v58 = vrot.slane %v1772_v61, %v4596_v51 }
 0x474   :  { %3226 = vmatprep.subr.mxu0 %v2638_v62  ;;  %3261 = vmatprep.subr.mxu1 %v2670_v22 }
 0x475   :  { %3227 = vmatpush3.msra.mxu0 %v2622_v9  ;;  %3262 = vmatpush3.msra.mxu1 %v2654_v49 }
 0x4d6   :  { %v2468_v0 = vpop.f32.mrf.mxu0  ;;  %v2509_v14 = vpop.f32.mrf.mxu1 }
 0x4d7   :  { %v2469_v29 = vadd.f32 %v2468_v0, %v1777_v37 }
 0x4d8   :  { %v2470_v31 = vpop.f32.mrf.mxu0  ;;  %v2511_v60 = vpop.f32.mrf.mxu1 }
 0x4d9   :  { %v2510_v20 = vadd.f32 %v2509_v14, %v2469_v29  ;;  %v2471_v45 = vadd.f32 %v2470_v31, %v1781_v63 }
 0x4da   :  { %v2472_v10 = vpop.f32.mrf.mxu0  ;;  %v2513_v25 = vpop.f32.mrf.mxu1 }
 0x4db   :  { %v2602_v27 = vmin.f32 %v2510_v20, 0.0  ;;  %v2512_v19 = vadd.f32 %v2511_v60, %v2471_v45  ;;  %vm2598_vm10 = vcmp.gt.f32.partialorder %v2510_v20, 0.0 }
 0x4dc   :  { %v2473_v36 = vpop.f32.mrf.mxu0  ;;  %v2514_v52 = vpop.f32.mrf.mxu1 }
 0x4dd   :  { %v2606_v6 = vmul.f32 1.442695, %v2602_v27  ;;  %v2603_v21 = vmin.f32 %v2512_v19, 0.0  ;;  %vm2599_vm9 = vcmp.gt.f32.partialorder %v2512_v19, 0.0 }
 0x4df   :  { %3291 = vpow2.f32 %v2606_v6  ;;  %v2608_v23 = vmul.f32 1.442695, %v2603_v21 }
 0x4e1   :  { %3293 = vpow2.f32 %v2608_v23 }
 0x4ec   :  { %v3292_v12 = vpop.eup %3291 }
 0x4ed   :  { %v3015_v44 = vadd.f32 -1.0, %v3292_v12 }
 0x4ee   :  { %v3294_v33 = vpop.eup %3293 }
 0x4ef   :  { %v3016_v2 = vadd.f32 -1.0, %v3294_v33  ;;  %v2618_v13 = vsel %vm2598_vm10, %v2510_v20, %v3015_v44 }
 0x4f1   :  { %v2619_v17 = vsel %vm2599_vm9, %v2512_v19, %v3016_v2 }
 0x4f2   :  { %2757 = vmatprep.mubr.f32.mxu0 %v2619_v17 }
 0x4f3   :  { %2758 = vmatmul.mubr.f32.vlgmr.msra.gmra.mxu0 %v2618_v13 }
 0x516   :  { %v2550_v62 = vpop.f32.mrf.mxu0  ;;  %v2591_v9 = vpop.f32.mrf.mxu1 }
 0x517   :  { %v2551_v11 = vadd.f32 %v2550_v62, %v1785_v15 }
 0x518   :  { %v2552_v50 = vpop.f32.mrf.mxu0  ;;  %v2593_v54 = vpop.f32.mrf.mxu1 }
 0x519   :  { %v2592_v39 = vadd.f32 %v2591_v9, %v2551_v11  ;;  %v2553_v43 = vadd.f32 %v2552_v50, %v1789_v58 }
 0x51a   :  { %v2554_v5 = vpop.f32.mrf.mxu0  ;;  %v2595_v7 = vpop.f32.mrf.mxu1 }
 0x51b   :  { %v2604_v42 = vmin.f32 %v2592_v39, 0.0  ;;  %v2594_v46 = vadd.f32 %v2593_v54, %v2553_v43  ;;  %vm2600_vm12 = vcmp.gt.f32.partialorder %v2592_v39, 0.0 }
 0x51c   :  { %v2555_v56 = vpop.f32.mrf.mxu0  ;;  %v2596_v41 = vpop.f32.mrf.mxu1 }
 0x51d   :  { %v2610_v18 = vmul.f32 1.442695, %v2604_v42  ;;  %v2605_v1 = vmin.f32 %v2594_v46, 0.0  ;;  %vm2601_vm11 = vcmp.gt.f32.partialorder %v2594_v46, 0.0 }
 0x51f   :  { %3295 = vpow2.f32 %v2610_v18  ;;  %v2612_v3 = vmul.f32 1.442695, %v2605_v1 }
 0x521   :  { %3297 = vpow2.f32 %v2612_v3 }
 0x52c   :  { %v3296_v24 = vpop.eup %3295 }
 0x52d   :  { %v3017_v34 = vadd.f32 -1.0, %v3296_v24 }
 0x52e   :  { %v3298_v51 = vpop.eup %3297 }
 0x52f   :  { %v3018_v38 = vadd.f32 -1.0, %v3298_v51  ;;  %v2620_v35 = vsel %vm2600_vm12, %v2592_v39, %v3017_v34 }
 0x531   :  { %v2621_v48 = vsel %vm2601_vm11, %v2594_v46, %v3018_v38 }
 0x532   :  { %2827 = vmatprep.mubr.f32.mxu1 %v2621_v48 }
 0x533   :  { %2828 = vmatmul.mubr.f32.vlgmr.msra.gmra.mxu1 %v2620_v35 }
 0x5b3   :  { %v3228_v47 = vpop.f32.mrf.mxu0 }
 0x5b5   :  { %v3229_v26 = vpop.f32.mrf.mxu0 }
 0x5b6   :  { %v3230_v16 = vadd.f32 %v3229_v26, %v3228_v47 }
 0x5b8   :  { %v2760_v53 = vadd.f32 %v3230_v16, %v3019_v8 }
 0x5f3   :  { %v3263_v28 = vpop.f32.mrf.mxu1 }
 0x5f5   :  { %v3264_v30 = vpop.f32.mrf.mxu1 }
 0x5f6   :  { %v3265_v4 = vadd.f32 %v3264_v30, %v3263_v28 }
 0x5f8   :  { %v2830_v55 = vadd.f32 %v3265_v4, %v2760_v53 }
 0x5fa   :  { %2837 = vrot.lane.b32.xlu0 %v2830_v55, %s3303_s2 }
 0x66c   :  { %v2838_v32 = vpop.permute.xlu0 %2837 }
 0x66d   :  { %2841 = vst.msk [vmem:[%s5134_s15] sm:$0x3] %vm2840_vm14, %v2838_v32 }
 0x66e   :  { %2846 = vsyncmov [#allocation3] }
 0x671   :  { %s2847_s7 = vpop.sfrf %2846 }
 0x672   :  { %p3020_p0 = scmp.ne.s32.totalorder %s2847_s7, 0 }
 0x674   :  { %2851 = shalt.err (%p3020_p0)  }

</bundles_post_ra>
